<compile_context>
chip_gen: v5e
topology: v5e:2x2
jax: 0.10.0
libtpu: 0.0.40
codegen_flags: <defaults>
</compile_context>

<pallas_src>
import functools

import jax
import jax.numpy as jnp
from jax.experimental import pallas as pl
from jax.experimental.pallas import tpu as pltpu


# ----------------------------- synthetic config ------------------------------
CFG = dict(
    leaky_relu=0.1,
    msd_kernels=[5, 5, 3],
    msd_strides=[1, 2, 1],
    msd_in_channels=[1, 8, 16],
    msd_out_channels=[8, 16, 16],
    msd_groups=[1, 2, 1],
    msd_out_kernel=3,
    msd_pool_kernel=4,
    msd_pool_stride=2,
)

MIN_LANES = 8   # minimum dense channel width kept on the lane axis


# ------------------------------ Pallas kernel ---------------------------------
def _fused_chain_kernel(*args, layers, slope):
    """One grid step == one batch item.  Runs the full conv chain with activations
    resident in VMEM; each layer's feature map is written to HBM once.

    args = [x_pad, W0, b0, ..., W3, b3,  o0..o3,  s0..s2]
    """
    n = len(layers)
    x_ref = args[0]
    w_refs = [args[1 + 2 * i] for i in range(n)]
    b_refs = [args[2 + 2 * i] for i in range(n)]
    o_refs = [args[1 + 2 * n + i] for i in range(n)]
    s_refs = [args[1 + 3 * n + i] for i in range(n - 1)]

    src = x_ref                                    # padded input of layer 0 (from HBM spec)
    for i, lay in enumerate(layers):
        K, stride = lay["k"], lay["stride"]
        L_out, C_out = lay["l_out"], lay["c_out"]

        # in-kernel im2col: static tap loop, dense channels on the lane axis
        acc = jnp.zeros((L_out, C_out), jnp.float32)
        for k in range(K):
            if stride == 1:
                xk = src[k:k + L_out, :]
            else:
                xk = src[pl.ds(k, L_out, stride=stride), :]
            acc = acc + jnp.dot(xk, w_refs[i][k],
                                preferred_element_type=jnp.float32)
        acc = acc + b_refs[i][...]
        if i < n - 1:                              # LeakyReLU on all but the out_conv
            acc = jnp.where(acc >= 0, acc, jnp.float32(slope) * acc)

        o_refs[i][...] = acc                       # single HBM write per layer (feature)

        if i < n - 1:                              # stage next layer's padded input in VMEM
            nxt = s_refs[i]
            p = layers[i + 1]["pad"]
            nxt[0:p, :] = jnp.zeros((p, C_out), jnp.float32)
            nxt[p + L_out:p + L_out + p, :] = jnp.zeros((p, C_out), jnp.float32)
            nxt[p:p + L_out, :] = acc
            src = nxt


def run_chain(x, chain, slope):
    """x: (B2, L, C_real) f32.  chain: list of packed-layer dicts (k/stride/pad/W/B...).
    Returns a list of per-layer feature maps (B2, L_out_i, C_out_i) f32."""
    B2, L, c_real = x.shape
    pad0, c_in0 = chain[0]["pad"], chain[0]["c_in"]
    # pad length for layer-0 conv and channels up to the dense lane width
    x = jnp.pad(x, ((0, 0), (pad0, pad0), (0, c_in0 - c_real)))

    # static per-layer config (lengths derived from the input length)
    cfg, L_cur = [], L
    for lay in chain:
        L_out = (L_cur + 2 * lay["pad"] - lay["k"]) // lay["stride"] + 1
        cfg.append(dict(k=lay["k"], stride=lay["stride"], pad=lay["pad"],
                        l_out=L_out, c_out=lay["c_out"]))
        L_cur = L_out

    n = len(chain)
    operands = [x]
    in_specs = [pl.BlockSpec((None, x.shape[1], x.shape[2]), lambda b: (b, 0, 0))]
    for lay in chain:
        operands += [lay["W"], lay["B"]]
        in_specs.append(pl.BlockSpec(lay["W"].shape, lambda b: (0, 0, 0)))
        in_specs.append(pl.BlockSpec(lay["B"].shape, lambda b: (0, 0)))

    out_specs, out_shapes = [], []
    for c in cfg:
        out_specs.append(pl.BlockSpec((None, c["l_out"], c["c_out"]),
                                      lambda b: (b, 0, 0)))
        out_shapes.append(jax.ShapeDtypeStruct((B2, c["l_out"], c["c_out"]),
                                               jnp.float32))

    # VMEM scratch: padded input buffer for every layer after the first (tiny)
    scratch = [pltpu.VMEM((cfg[i]["l_out"] + 2 * cfg[i + 1]["pad"], cfg[i]["c_out"]),
                          jnp.float32) for i in range(n - 1)]

    outs = pl.pallas_call(
        functools.partial(_fused_chain_kernel, layers=cfg, slope=float(slope)),
        grid=(B2,),
        in_specs=in_specs,
        out_specs=out_specs,
        out_shape=out_shapes,
        scratch_shapes=scratch,
        compiler_params=pltpu.CompilerParams(
            dimension_semantics=("parallel",)),
    )(*operands)
    return list(outs)


# ----------------------- parameter init & dense packing ------------------------
def init_submsd_params(key):
    params = {"convs": []}
    n = len(CFG["msd_kernels"])
    for i in range(n):
        key, k1, k2 = jax.random.split(key, 3)
        cin, cout = CFG["msd_in_channels"][i], CFG["msd_out_channels"][i]
        k, g = CFG["msd_kernels"][i], CFG["msd_groups"][i]
        w = 0.1 * jax.random.normal(k1, (cout, cin // g, k), jnp.float32)
        b = 0.1 * jax.random.normal(k2, (cout,), jnp.float32)
        params["convs"].append((w, b))
    key, k1, k2 = jax.random.split(key, 3)
    cout_last, ko = CFG["msd_out_channels"][-1], CFG["msd_out_kernel"]
    params["out_conv"] = (
        0.1 * jax.random.normal(k1, (1, cout_last, ko), jnp.float32),
        0.1 * jax.random.normal(k2, (1,), jnp.float32),
    )
    return params


def _pack_into(W, B, w, b, groups, in_off, out_off):
    """w: PyTorch Conv1d weight (C_out, C_in/groups, K); packs into dense
    W (K, C_in_total, C_out_total) block-diagonally (per disc and per group)."""
    C_out, C_in_g, K = w.shape
    C_out_g = C_out // groups
    w_t = jnp.transpose(w, (2, 1, 0))              # (K, C_in_g, C_out)
    for g in range(groups):
        r0 = in_off + g * C_in_g
        c0 = out_off + g * C_out_g
        W = W.at[:, r0:r0 + C_in_g, c0:c0 + C_out_g].set(
            w_t[:, :, g * C_out_g:(g + 1) * C_out_g])
    B = B.at[0, out_off:out_off + C_out].set(b)
    return W, B


def pack_chain(raw_discs):
    """Pack 1 (disc0) or 2 (pooled discs 1&2, identical input) SubMSDs into one dense
    block-diagonal conv chain.  Channels are packed densely (no 128-lane padding); only
    the first layer's input and the last layer's output are padded up to MIN_LANES."""
    nd = len(raw_discs)
    n_conv = len(CFG["msd_kernels"])
    chain = []
    c_prev = max(MIN_LANES, CFG["msd_in_channels"][0] * nd)
    for i in range(n_conv + 1):
        if i < n_conv:
            k, s = CFG["msd_kernels"][i], CFG["msd_strides"][i]
            p, g = CFG["msd_kernels"][i] // 2, CFG["msd_groups"][i]
            cin_real, cout_real = CFG["msd_in_channels"][i], CFG["msd_out_channels"][i]
        else:
            # Reference module: Conv1d(..., padding=msd_out_kernel) — kept as in spec.
            k, s, p, g = CFG["msd_out_kernel"], 1, CFG["msd_out_kernel"], 1
            cin_real, cout_real = CFG["msd_out_channels"][-1], 1
        c_in = c_prev
        c_out = max(MIN_LANES, cout_real * nd) if i == n_conv else cout_real * nd
        W = jnp.zeros((k, c_in, c_out), jnp.float32)
        Bv = jnp.zeros((1, c_out), jnp.float32)
        for d in range(nd):
            w, b = (raw_discs[d]["convs"][i] if i < n_conv
                    else raw_discs[d]["out_conv"])
            W, Bv = _pack_into(W, Bv, w, b, g, d * cin_real, d * cout_real)
        chain.append(dict(k=k, stride=s, pad=p, c_in=c_in, c_out=c_out,
                          c_out_real=cout_real, W=W, B=Bv))
        c_prev = c_out
    return chain


# --------------------------------- forward ------------------------------------
def avgpool1d(x, kernel, stride, padding):
    """PyTorch AvgPool1d (count_include_pad=True, ceil_mode=False).  x: (B, C, L).
    Plain-JAX VPU mean — a 4-tap mean is not MXU work."""
    x_pad = jnp.pad(x, ((0, 0), (0, 0), (padding, padding)))
    L_out = (x.shape[-1] + 2 * padding - kernel) // stride + 1
    idx = (jnp.arange(L_out) * stride)[:, None] + jnp.arange(kernel)[None, :]
    return x_pad[:, :, idx].mean(axis=-1)


def _collect(acts, chain, disc_idx, B):
    """Slice one disc's dense channel block out of a packed chain's activations.
    Returns ((real_out, real_feats), (gen_out, gen_feats)) with PyTorch NCL features."""
    feats = []
    for a, lay in zip(acts, chain):
        c = lay["c_out_real"]
        off = disc_idx * c
        feats.append(jnp.transpose(a[:, :, off:off + c], (0, 2, 1)))   # (2B, C, L)
    out_flat = acts[-1][:, :, disc_idx]                                # (2B, L_out)
    real = (out_flat[:B], [f[:B] for f in feats])
    gen = (out_flat[B:], [f[B:] for f in feats])
    return real, gen


def msdiscriminator_forward(packed, real_input, gen_input):
    B = real_input.shape[0]
    both = jnp.concatenate([real_input, gen_input], axis=0)      # (2B, 1, L) real/gen batched

    # disc 0: raw-rate signal, one dense channel
    x0 = jnp.transpose(both, (0, 2, 1))                          # (2B, L, 1)
    acts0 = run_chain(x0, packed["disc0"], CFG["leaky_relu"])

    # discs 1 & 2: identical AvgPool1d input (computed once); the two discs are packed
    # side by side in the channel dim, so the signal is duplicated into channels 0 & 1.
    pooled = avgpool1d(both, CFG["msd_pool_kernel"], CFG["msd_pool_stride"],
                       CFG["msd_pool_kernel"] // 2)              # (2B, 1, Lp)
    sig = pooled[:, 0, :]
    xp = jnp.stack([sig, sig], axis=-1)                          # (2B, Lp, 2)
    actsp = run_chain(xp, packed["pooled"], CFG["leaky_relu"])

    real_outputs, gen_outputs, real_features, gen_features = [], [], [], []
    for acts, chain, idx in ((acts0, packed["disc0"], 0),
                             (actsp, packed["pooled"], 0),
                             (actsp, packed["pooled"], 1)):
        (r_out, r_feat), (g_out, g_feat) = _collect(acts, chain, idx, B)
        real_outputs.append(r_out); gen_outputs.append(g_out)
        real_features.append(r_feat); gen_features.append(g_feat)
    return real_outputs, gen_outputs, real_features, gen_features


# ------------------------- pure-JAX reference (validation) ---------------------
def _ref_conv1d(x, w, b, stride, padding, groups):
    out = jax.lax.conv_general_dilated(
        x, w, window_strides=(stride,), padding=[(padding, padding)],
        dimension_numbers=("NCH", "OIH", "NCH"), feature_group_count=groups,
        precision=jax.lax.Precision.HIGHEST)
    return out + b[None, :, None]


def _ref_submsd(params, x):
    feats, out = [], x
    for i in range(len(CFG["msd_kernels"])):
        w, b = params["convs"][i]
        out = _ref_conv1d(out, w, b, CFG["msd_strides"][i],
                          CFG["msd_kernels"][i] // 2, CFG["msd_groups"][i])
        out = jnp.where(out >= 0, out, CFG["leaky_relu"] * out)
        feats.append(out)
    w, b = params["out_conv"]
    out = _ref_conv1d(out, w, b, 1, CFG["msd_out_kernel"], 1)
    feats.append(out)
    return out.reshape(out.shape[0], -1), feats


def _ref_forward(raw_params, real_input, gen_input):
    pool = lambda x: avgpool1d(x, CFG["msd_pool_kernel"], CFG["msd_pool_stride"],
                               CFG["msd_pool_kernel"] // 2)
    real_outputs, gen_outputs, real_features, gen_features = [], [], [], []
    for i in range(3):
        r_in = real_input if i == 0 else pool(real_input)
        g_in = gen_input if i == 0 else pool(gen_input)
        r_o, r_f = _ref_submsd(raw_params[i], r_in)
        g_o, g_f = _ref_submsd(raw_params[i], g_in)
        real_outputs.append(r_o); gen_outputs.append(g_o)
        real_features.append(r_f); gen_features.append(g_f)
    return real_outputs, gen_outputs, real_features, gen_features


# ----------------------------------- main --------------------------------------
if __name__ == "__main__":
    key = jax.random.PRNGKey(0)
    kp, kr, kg = jax.random.split(key, 3)

    raw_params = [init_submsd_params(k) for k in jax.random.split(kp, 3)]
    packed = dict(disc0=pack_chain([raw_params[0]]),
                  pooled=pack_chain([raw_params[1], raw_params[2]]))   # packed once

    B, C, L = 2, 1, 64
    real_input = jax.random.normal(kr, (B, C, L), jnp.float32)
    gen_input = jax.random.normal(kg, (B, C, L), jnp.float32)

    fwd = jax.jit(functools.partial(msdiscriminator_forward, packed))
    outs = jax.block_until_ready(fwd(real_input, gen_input))
    real_outputs, gen_outputs, real_features, gen_features = outs

    # structural checks
    assert len(real_outputs) == 3 and len(gen_outputs) == 3
    assert all(len(f) == len(CFG["msd_kernels"]) + 1 for f in real_features)
    assert real_features[0][0].shape == (B, CFG["msd_out_channels"][0], L)
    assert all(bool(jnp.all(jnp.isfinite(o))) for o in real_outputs + gen_outputs)

    # numerical check against a pure-JAX (lax.conv) reference of the module
    ref = _ref_forward(raw_params, real_input, gen_input)
    flat_k = jax.tree_util.tree_leaves(outs)
    flat_r = jax.tree_util.tree_leaves(ref)
    assert len(flat_k) == len(flat_r)
    for a, b in zip(flat_k, flat_r):
        assert a.shape == b.shape, (a.shape, b.shape)
        assert bool(jnp.allclose(a, b, rtol=2e-2, atol=5e-3)), \
            float(jnp.max(jnp.abs(a - b)))

    print("KERNEL_OK")
</pallas_src>

<mosaic_0001>
module attributes {stable_mosaic.version = 11 : i64} {
  func.func @_fused_chain_kernel(%arg0: i32, %arg1: memref<1x68x8xf32, #tpu.memory_space<vmem>>, %arg2: memref<5x8x8xf32, #tpu.memory_space<vmem>>, %arg3: memref<1x8xf32, #tpu.memory_space<vmem>>, %arg4: memref<5x8x16xf32, #tpu.memory_space<vmem>>, %arg5: memref<1x16xf32, #tpu.memory_space<vmem>>, %arg6: memref<3x16x16xf32, #tpu.memory_space<vmem>>, %arg7: memref<1x16xf32, #tpu.memory_space<vmem>>, %arg8: memref<3x16x8xf32, #tpu.memory_space<vmem>>, %arg9: memref<1x8xf32, #tpu.memory_space<vmem>>, %arg10: memref<1x64x8xf32, #tpu.memory_space<vmem>>, %arg11: memref<1x32x16xf32, #tpu.memory_space<vmem>>, %arg12: memref<1x32x16xf32, #tpu.memory_space<vmem>>, %arg13: memref<1x36x8xf32, #tpu.memory_space<vmem>>, %arg14: memref<68x8xf32, #tpu.memory_space<vmem>>, %arg15: memref<34x16xf32, #tpu.memory_space<vmem>>, %arg16: memref<38x16xf32, #tpu.memory_space<vmem>>) attributes {dimension_semantics = [#tpu.dimension_semantics<parallel>], iteration_bounds = array<i64: 4>, scalar_prefetch = 0 : i64, scratch_operands = 3 : i64, tpu.core_type = #tpu.core_type<tc>, window_params = [{transform_indices = @transform_0, window_bounds = array<i64: 1, 68, 8>}, {pipeline_mode = #tpu.pipeline_mode<synchronous>, transform_indices = @transform_1, window_bounds = array<i64: 5, 8, 8>}, {pipeline_mode = #tpu.pipeline_mode<synchronous>, transform_indices = @transform_2, window_bounds = array<i64: 1, 8>}, {pipeline_mode = #tpu.pipeline_mode<synchronous>, transform_indices = @transform_3, window_bounds = array<i64: 5, 8, 16>}, {pipeline_mode = #tpu.pipeline_mode<synchronous>, transform_indices = @transform_4, window_bounds = array<i64: 1, 16>}, {pipeline_mode = #tpu.pipeline_mode<synchronous>, transform_indices = @transform_5, window_bounds = array<i64: 3, 16, 16>}, {pipeline_mode = #tpu.pipeline_mode<synchronous>, transform_indices = @transform_6, window_bounds = array<i64: 1, 16>}, {pipeline_mode = #tpu.pipeline_mode<synchronous>, transform_indices = @transform_7, window_bounds = array<i64: 3, 16, 8>}, {pipeline_mode = #tpu.pipeline_mode<synchronous>, transform_indices = @transform_8, window_bounds = array<i64: 1, 8>}, {transform_indices = @transform_9, window_bounds = array<i64: 1, 64, 8>}, {transform_indices = @transform_10, window_bounds = array<i64: 1, 32, 16>}, {transform_indices = @transform_11, window_bounds = array<i64: 1, 32, 16>}, {transform_indices = @transform_12, window_bounds = array<i64: 1, 36, 8>}]} {
    %cst = arith.constant 0.000000e+00 : f32
    %0 = vector.broadcast %cst : f32 to vector<64x8xf32>
    %c0 = arith.constant 0 : index
    %c0_0 = arith.constant 0 : index
    %c0_1 = arith.constant 0 : index
    %1 = vector.load %arg1[%c0, %c0_0, %c0_1] : memref<1x68x8xf32, #tpu.memory_space<vmem>>, vector<1x64x8xf32>
    %2 = vector.shape_cast %1 : vector<1x64x8xf32> to vector<64x8xf32>
    %c0_2 = arith.constant 0 : index
    %c0_3 = arith.constant 0 : index
    %c0_4 = arith.constant 0 : index
    %3 = vector.load %arg2[%c0_2, %c0_3, %c0_4] : memref<5x8x8xf32, #tpu.memory_space<vmem>>, vector<1x8x8xf32>
    %4 = vector.shape_cast %3 : vector<1x8x8xf32> to vector<8x8xf32>
    %cst_5 = arith.constant dense<0.000000e+00> : vector<64x8xf32>
    %5 = tpu.matmul %2, %4, %cst_5 {dimension_numbers = #tpu.dot_dimension_numbers<[1], [0], [0], [1], [0, 0, 1, 1], [], []>} : vector<64x8xf32>, vector<8x8xf32>, vector<64x8xf32> -> vector<64x8xf32>
    %6 = arith.addf %0, %5 : vector<64x8xf32>
    %c0_6 = arith.constant 0 : index
    %c1 = arith.constant 1 : index
    %c0_7 = arith.constant 0 : index
    %7 = vector.load %arg1[%c0_6, %c1, %c0_7] : memref<1x68x8xf32, #tpu.memory_space<vmem>>, vector<1x64x8xf32>
    %8 = vector.shape_cast %7 : vector<1x64x8xf32> to vector<64x8xf32>
    %c1_8 = arith.constant 1 : index
    %c0_9 = arith.constant 0 : index
    %c0_10 = arith.constant 0 : index
    %9 = vector.load %arg2[%c1_8, %c0_9, %c0_10] : memref<5x8x8xf32, #tpu.memory_space<vmem>>, vector<1x8x8xf32>
    %10 = vector.shape_cast %9 : vector<1x8x8xf32> to vector<8x8xf32>
    %cst_11 = arith.constant dense<0.000000e+00> : vector<64x8xf32>
    %11 = tpu.matmul %8, %10, %cst_11 {dimension_numbers = #tpu.dot_dimension_numbers<[1], [0], [0], [1], [0, 0, 1, 1], [], []>} : vector<64x8xf32>, vector<8x8xf32>, vector<64x8xf32> -> vector<64x8xf32>
    %12 = arith.addf %6, %11 : vector<64x8xf32>
    %c0_12 = arith.constant 0 : index
    %c2 = arith.constant 2 : index
    %c0_13 = arith.constant 0 : index
    %13 = vector.load %arg1[%c0_12, %c2, %c0_13] : memref<1x68x8xf32, #tpu.memory_space<vmem>>, vector<1x64x8xf32>
    %14 = vector.shape_cast %13 : vector<1x64x8xf32> to vector<64x8xf32>
    %c2_14 = arith.constant 2 : index
    %c0_15 = arith.constant 0 : index
    %c0_16 = arith.constant 0 : index
    %15 = vector.load %arg2[%c2_14, %c0_15, %c0_16] : memref<5x8x8xf32, #tpu.memory_space<vmem>>, vector<1x8x8xf32>
    %16 = vector.shape_cast %15 : vector<1x8x8xf32> to vector<8x8xf32>
    %cst_17 = arith.constant dense<0.000000e+00> : vector<64x8xf32>
    %17 = tpu.matmul %14, %16, %cst_17 {dimension_numbers = #tpu.dot_dimension_numbers<[1], [0], [0], [1], [0, 0, 1, 1], [], []>} : vector<64x8xf32>, vector<8x8xf32>, vector<64x8xf32> -> vector<64x8xf32>
    %18 = arith.addf %12, %17 : vector<64x8xf32>
    %c0_18 = arith.constant 0 : index
    %c3 = arith.constant 3 : index
    %c0_19 = arith.constant 0 : index
    %19 = vector.load %arg1[%c0_18, %c3, %c0_19] : memref<1x68x8xf32, #tpu.memory_space<vmem>>, vector<1x64x8xf32>
    %20 = vector.shape_cast %19 : vector<1x64x8xf32> to vector<64x8xf32>
    %c3_20 = arith.constant 3 : index
    %c0_21 = arith.constant 0 : index
    %c0_22 = arith.constant 0 : index
    %21 = vector.load %arg2[%c3_20, %c0_21, %c0_22] : memref<5x8x8xf32, #tpu.memory_space<vmem>>, vector<1x8x8xf32>
    %22 = vector.shape_cast %21 : vector<1x8x8xf32> to vector<8x8xf32>
    %cst_23 = arith.constant dense<0.000000e+00> : vector<64x8xf32>
    %23 = tpu.matmul %20, %22, %cst_23 {dimension_numbers = #tpu.dot_dimension_numbers<[1], [0], [0], [1], [0, 0, 1, 1], [], []>} : vector<64x8xf32>, vector<8x8xf32>, vector<64x8xf32> -> vector<64x8xf32>
    %24 = arith.addf %18, %23 : vector<64x8xf32>
    %c0_24 = arith.constant 0 : index
    %c4 = arith.constant 4 : index
    %c0_25 = arith.constant 0 : index
    %25 = vector.load %arg1[%c0_24, %c4, %c0_25] : memref<1x68x8xf32, #tpu.memory_space<vmem>>, vector<1x64x8xf32>
    %26 = vector.shape_cast %25 : vector<1x64x8xf32> to vector<64x8xf32>
    %c4_26 = arith.constant 4 : index
    %c0_27 = arith.constant 0 : index
    %c0_28 = arith.constant 0 : index
    %27 = vector.load %arg2[%c4_26, %c0_27, %c0_28] : memref<5x8x8xf32, #tpu.memory_space<vmem>>, vector<1x8x8xf32>
    %28 = vector.shape_cast %27 : vector<1x8x8xf32> to vector<8x8xf32>
    %cst_29 = arith.constant dense<0.000000e+00> : vector<64x8xf32>
    %29 = tpu.matmul %26, %28, %cst_29 {dimension_numbers = #tpu.dot_dimension_numbers<[1], [0], [0], [1], [0, 0, 1, 1], [], []>} : vector<64x8xf32>, vector<8x8xf32>, vector<64x8xf32> -> vector<64x8xf32>
    %30 = arith.addf %24, %29 : vector<64x8xf32>
    %c0_30 = arith.constant 0 : index
    %c0_31 = arith.constant 0 : index
    %31 = vector.load %arg3[%c0_30, %c0_31] : memref<1x8xf32, #tpu.memory_space<vmem>>, vector<1x8xf32>
    %32 = vector.broadcast %31 : vector<1x8xf32> to vector<64x8xf32>
    %33 = arith.addf %30, %32 : vector<64x8xf32>
    %cst_32 = arith.constant 0.000000e+00 : f32
    %34 = vector.broadcast %cst_32 : f32 to vector<64x8xf32>
    %35 = arith.cmpf oge, %33, %34 : vector<64x8xf32>
    %cst_33 = arith.constant 1.000000e-01 : f32
    %36 = vector.broadcast %cst_33 : f32 to vector<64x8xf32>
    %37 = arith.mulf %36, %33 : vector<64x8xf32>
    %38 = arith.select %35, %33, %37 : vector<64x8xi1>, vector<64x8xf32>
    %c0_34 = arith.constant 0 : index
    %c0_35 = arith.constant 0 : index
    %c0_36 = arith.constant 0 : index
    %39 = vector.load %arg10[%c0_34, %c0_35, %c0_36] : memref<1x64x8xf32, #tpu.memory_space<vmem>>, vector<1x64x8xf32>
    %40 = vector.shape_cast %39 : vector<1x64x8xf32> to vector<64x8xf32>
    %41 = vector.shape_cast %38 : vector<64x8xf32> to vector<1x64x8xf32>
    tpu.vector_store %arg10[%c0_34, %c0_35, %c0_36], %41 {strides = array<i32>} : memref<1x64x8xf32, #tpu.memory_space<vmem>>, vector<1x64x8xf32>,
    %cst_37 = arith.constant 0.000000e+00 : f32
    %42 = vector.broadcast %cst_37 : f32 to vector<2x8xf32>
    %c0_38 = arith.constant 0 : index
    %c0_39 = arith.constant 0 : index
    %43 = vector.load %arg14[%c0_38, %c0_39] : memref<68x8xf32, #tpu.memory_space<vmem>>, vector<2x8xf32>
    tpu.vector_store %arg14[%c0_38, %c0_39], %42 {strides = array<i32>} : memref<68x8xf32, #tpu.memory_space<vmem>>, vector<2x8xf32>,
    %cst_40 = arith.constant 0.000000e+00 : f32
    %44 = vector.broadcast %cst_40 : f32 to vector<2x8xf32>
    %c66 = arith.constant 66 : index
    %c0_41 = arith.constant 0 : index
    %45 = vector.load %arg14[%c66, %c0_41] : memref<68x8xf32, #tpu.memory_space<vmem>>, vector<2x8xf32>
    tpu.vector_store %arg14[%c66, %c0_41], %44 {strides = array<i32>} : memref<68x8xf32, #tpu.memory_space<vmem>>, vector<2x8xf32>,
    %c2_42 = arith.constant 2 : index
    %c0_43 = arith.constant 0 : index
    %46 = vector.load %arg14[%c2_42, %c0_43] : memref<68x8xf32, #tpu.memory_space<vmem>>, vector<64x8xf32>
    tpu.vector_store %arg14[%c2_42, %c0_43], %38 {strides = array<i32>} : memref<68x8xf32, #tpu.memory_space<vmem>>, vector<64x8xf32>,
    %cst_44 = arith.constant 0.000000e+00 : f32
    %47 = vector.broadcast %cst_44 : f32 to vector<32x16xf32>
    %c0_45 = arith.constant 0 : index
    %c0_46 = arith.constant 0 : index
    %48 = tpu.strided_load %arg14[%c0_45, %c0_46] {strides = array<i32: 2, 1>} : memref<68x8xf32, #tpu.memory_space<vmem>>, vector<32x8xf32>
    %c0_47 = arith.constant 0 : index
    %c0_48 = arith.constant 0 : index
    %c0_49 = arith.constant 0 : index
    %49 = vector.load %arg4[%c0_47, %c0_48, %c0_49] : memref<5x8x16xf32, #tpu.memory_space<vmem>>, vector<1x8x16xf32>
    %50 = vector.shape_cast %49 : vector<1x8x16xf32> to vector<8x16xf32>
    %cst_50 = arith.constant dense<0.000000e+00> : vector<32x16xf32>
    %51 = tpu.matmul %48, %50, %cst_50 {dimension_numbers = #tpu.dot_dimension_numbers<[1], [0], [0], [1], [0, 0, 1, 1], [], []>} : vector<32x8xf32>, vector<8x16xf32>, vector<32x16xf32> -> vector<32x16xf32>
    %52 = arith.addf %47, %51 : vector<32x16xf32>
    %c1_51 = arith.constant 1 : index
    %c0_52 = arith.constant 0 : index
    %53 = tpu.strided_load %arg14[%c1_51, %c0_52] {strides = array<i32: 2, 1>} : memref<68x8xf32, #tpu.memory_space<vmem>>, vector<32x8xf32>
    %c1_53 = arith.constant 1 : index
    %c0_54 = arith.constant 0 : index
    %c0_55 = arith.constant 0 : index
    %54 = vector.load %arg4[%c1_53, %c0_54, %c0_55] : memref<5x8x16xf32, #tpu.memory_space<vmem>>, vector<1x8x16xf32>
    %55 = vector.shape_cast %54 : vector<1x8x16xf32> to vector<8x16xf32>
    %cst_56 = arith.constant dense<0.000000e+00> : vector<32x16xf32>
    %56 = tpu.matmul %53, %55, %cst_56 {dimension_numbers = #tpu.dot_dimension_numbers<[1], [0], [0], [1], [0, 0, 1, 1], [], []>} : vector<32x8xf32>, vector<8x16xf32>, vector<32x16xf32> -> vector<32x16xf32>
    %57 = arith.addf %52, %56 : vector<32x16xf32>
    %c2_57 = arith.constant 2 : index
    %c0_58 = arith.constant 0 : index
    %58 = tpu.strided_load %arg14[%c2_57, %c0_58] {strides = array<i32: 2, 1>} : memref<68x8xf32, #tpu.memory_space<vmem>>, vector<32x8xf32>
    %c2_59 = arith.constant 2 : index
    %c0_60 = arith.constant 0 : index
    %c0_61 = arith.constant 0 : index
    %59 = vector.load %arg4[%c2_59, %c0_60, %c0_61] : memref<5x8x16xf32, #tpu.memory_space<vmem>>, vector<1x8x16xf32>
    %60 = vector.shape_cast %59 : vector<1x8x16xf32> to vector<8x16xf32>
    %cst_62 = arith.constant dense<0.000000e+00> : vector<32x16xf32>
    %61 = tpu.matmul %58, %60, %cst_62 {dimension_numbers = #tpu.dot_dimension_numbers<[1], [0], [0], [1], [0, 0, 1, 1], [], []>} : vector<32x8xf32>, vector<8x16xf32>, vector<32x16xf32> -> vector<32x16xf32>
    %62 = arith.addf %57, %61 : vector<32x16xf32>
    %c3_63 = arith.constant 3 : index
    %c0_64 = arith.constant 0 : index
    %63 = tpu.strided_load %arg14[%c3_63, %c0_64] {strides = array<i32: 2, 1>} : memref<68x8xf32, #tpu.memory_space<vmem>>, vector<32x8xf32>
    %c3_65 = arith.constant 3 : index
    %c0_66 = arith.constant 0 : index
    %c0_67 = arith.constant 0 : index
    %64 = vector.load %arg4[%c3_65, %c0_66, %c0_67] : memref<5x8x16xf32, #tpu.memory_space<vmem>>, vector<1x8x16xf32>
    %65 = vector.shape_cast %64 : vector<1x8x16xf32> to vector<8x16xf32>
    %cst_68 = arith.constant dense<0.000000e+00> : vector<32x16xf32>
    %66 = tpu.matmul %63, %65, %cst_68 {dimension_numbers = #tpu.dot_dimension_numbers<[1], [0], [0], [1], [0, 0, 1, 1], [], []>} : vector<32x8xf32>, vector<8x16xf32>, vector<32x16xf32> -> vector<32x16xf32>
    %67 = arith.addf %62, %66 : vector<32x16xf32>
    %c4_69 = arith.constant 4 : index
    %c0_70 = arith.constant 0 : index
    %68 = tpu.strided_load %arg14[%c4_69, %c0_70] {strides = array<i32: 2, 1>} : memref<68x8xf32, #tpu.memory_space<vmem>>, vector<32x8xf32>
    %c4_71 = arith.constant 4 : index
    %c0_72 = arith.constant 0 : index
    %c0_73 = arith.constant 0 : index
    %69 = vector.load %arg4[%c4_71, %c0_72, %c0_73] : memref<5x8x16xf32, #tpu.memory_space<vmem>>, vector<1x8x16xf32>
    %70 = vector.shape_cast %69 : vector<1x8x16xf32> to vector<8x16xf32>
    %cst_74 = arith.constant dense<0.000000e+00> : vector<32x16xf32>
    %71 = tpu.matmul %68, %70, %cst_74 {dimension_numbers = #tpu.dot_dimension_numbers<[1], [0], [0], [1], [0, 0, 1, 1], [], []>} : vector<32x8xf32>, vector<8x16xf32>, vector<32x16xf32> -> vector<32x16xf32>
    %72 = arith.addf %67, %71 : vector<32x16xf32>
    %c0_75 = arith.constant 0 : index
    %c0_76 = arith.constant 0 : index
    %73 = vector.load %arg5[%c0_75, %c0_76] : memref<1x16xf32, #tpu.memory_space<vmem>>, vector<1x16xf32>
    %74 = vector.broadcast %73 : vector<1x16xf32> to vector<32x16xf32>
    %75 = arith.addf %72, %74 : vector<32x16xf32>
    %cst_77 = arith.constant 0.000000e+00 : f32
    %76 = vector.broadcast %cst_77 : f32 to vector<32x16xf32>
    %77 = arith.cmpf oge, %75, %76 : vector<32x16xf32>
    %cst_78 = arith.constant 1.000000e-01 : f32
    %78 = vector.broadcast %cst_78 : f32 to vector<32x16xf32>
    %79 = arith.mulf %78, %75 : vector<32x16xf32>
    %80 = arith.select %77, %75, %79 : vector<32x16xi1>, vector<32x16xf32>
    %c0_79 = arith.constant 0 : index
    %c0_80 = arith.constant 0 : index
    %c0_81 = arith.constant 0 : index
    %81 = vector.load %arg11[%c0_79, %c0_80, %c0_81] : memref<1x32x16xf32, #tpu.memory_space<vmem>>, vector<1x32x16xf32>
    %82 = vector.shape_cast %81 : vector<1x32x16xf32> to vector<32x16xf32>
    %83 = vector.shape_cast %80 : vector<32x16xf32> to vector<1x32x16xf32>
    tpu.vector_store %arg11[%c0_79, %c0_80, %c0_81], %83 {strides = array<i32>} : memref<1x32x16xf32, #tpu.memory_space<vmem>>, vector<1x32x16xf32>,
    %cst_82 = arith.constant 0.000000e+00 : f32
    %84 = vector.broadcast %cst_82 : f32 to vector<1x16xf32>
    %c0_83 = arith.constant 0 : index
    %c0_84 = arith.constant 0 : index
    %85 = vector.load %arg15[%c0_83, %c0_84] : memref<34x16xf32, #tpu.memory_space<vmem>>, vector<1x16xf32>
    tpu.vector_store %arg15[%c0_83, %c0_84], %84 {strides = array<i32>} : memref<34x16xf32, #tpu.memory_space<vmem>>, vector<1x16xf32>,
    %cst_85 = arith.constant 0.000000e+00 : f32
    %86 = vector.broadcast %cst_85 : f32 to vector<1x16xf32>
    %c33 = arith.constant 33 : index
    %c0_86 = arith.constant 0 : index
    %87 = vector.load %arg15[%c33, %c0_86] : memref<34x16xf32, #tpu.memory_space<vmem>>, vector<1x16xf32>
    tpu.vector_store %arg15[%c33, %c0_86], %86 {strides = array<i32>} : memref<34x16xf32, #tpu.memory_space<vmem>>, vector<1x16xf32>,
    %c1_87 = arith.constant 1 : index
    %c0_88 = arith.constant 0 : index
    %88 = vector.load %arg15[%c1_87, %c0_88] : memref<34x16xf32, #tpu.memory_space<vmem>>, vector<32x16xf32>
    tpu.vector_store %arg15[%c1_87, %c0_88], %80 {strides = array<i32>} : memref<34x16xf32, #tpu.memory_space<vmem>>, vector<32x16xf32>,
    %cst_89 = arith.constant 0.000000e+00 : f32
    %89 = vector.broadcast %cst_89 : f32 to vector<32x16xf32>
    %c0_90 = arith.constant 0 : index
    %c0_91 = arith.constant 0 : index
    %90 = vector.load %arg15[%c0_90, %c0_91] : memref<34x16xf32, #tpu.memory_space<vmem>>, vector<32x16xf32>
    %c0_92 = arith.constant 0 : index
    %c0_93 = arith.constant 0 : index
    %c0_94 = arith.constant 0 : index
    %91 = vector.load %arg6[%c0_92, %c0_93, %c0_94] : memref<3x16x16xf32, #tpu.memory_space<vmem>>, vector<1x16x16xf32>
    %92 = vector.shape_cast %91 : vector<1x16x16xf32> to vector<16x16xf32>
    %cst_95 = arith.constant dense<0.000000e+00> : vector<32x16xf32>
    %93 = tpu.matmul %90, %92, %cst_95 {dimension_numbers = #tpu.dot_dimension_numbers<[1], [0], [0], [1], [0, 0, 1, 1], [], []>} : vector<32x16xf32>, vector<16x16xf32>, vector<32x16xf32> -> vector<32x16xf32>
    %94 = arith.addf %89, %93 : vector<32x16xf32>
    %c1_96 = arith.constant 1 : index
    %c0_97 = arith.constant 0 : index
    %95 = vector.load %arg15[%c1_96, %c0_97] : memref<34x16xf32, #tpu.memory_space<vmem>>, vector<32x16xf32>
    %c1_98 = arith.constant 1 : index
    %c0_99 = arith.constant 0 : index
    %c0_100 = arith.constant 0 : index
    %96 = vector.load %arg6[%c1_98, %c0_99, %c0_100] : memref<3x16x16xf32, #tpu.memory_space<vmem>>, vector<1x16x16xf32>
    %97 = vector.shape_cast %96 : vector<1x16x16xf32> to vector<16x16xf32>
    %cst_101 = arith.constant dense<0.000000e+00> : vector<32x16xf32>
    %98 = tpu.matmul %95, %97, %cst_101 {dimension_numbers = #tpu.dot_dimension_numbers<[1], [0], [0], [1], [0, 0, 1, 1], [], []>} : vector<32x16xf32>, vector<16x16xf32>, vector<32x16xf32> -> vector<32x16xf32>
    %99 = arith.addf %94, %98 : vector<32x16xf32>
    %c2_102 = arith.constant 2 : index
    %c0_103 = arith.constant 0 : index
    %100 = vector.load %arg15[%c2_102, %c0_103] : memref<34x16xf32, #tpu.memory_space<vmem>>, vector<32x16xf32>
    %c2_104 = arith.constant 2 : index
    %c0_105 = arith.constant 0 : index
    %c0_106 = arith.constant 0 : index
    %101 = vector.load %arg6[%c2_104, %c0_105, %c0_106] : memref<3x16x16xf32, #tpu.memory_space<vmem>>, vector<1x16x16xf32>
    %102 = vector.shape_cast %101 : vector<1x16x16xf32> to vector<16x16xf32>
    %cst_107 = arith.constant dense<0.000000e+00> : vector<32x16xf32>
    %103 = tpu.matmul %100, %102, %cst_107 {dimension_numbers = #tpu.dot_dimension_numbers<[1], [0], [0], [1], [0, 0, 1, 1], [], []>} : vector<32x16xf32>, vector<16x16xf32>, vector<32x16xf32> -> vector<32x16xf32>
    %104 = arith.addf %99, %103 : vector<32x16xf32>
    %c0_108 = arith.constant 0 : index
    %c0_109 = arith.constant 0 : index
    %105 = vector.load %arg7[%c0_108, %c0_109] : memref<1x16xf32, #tpu.memory_space<vmem>>, vector<1x16xf32>
    %106 = vector.broadcast %105 : vector<1x16xf32> to vector<32x16xf32>
    %107 = arith.addf %104, %106 : vector<32x16xf32>
    %cst_110 = arith.constant 0.000000e+00 : f32
    %108 = vector.broadcast %cst_110 : f32 to vector<32x16xf32>
    %109 = arith.cmpf oge, %107, %108 : vector<32x16xf32>
    %cst_111 = arith.constant 1.000000e-01 : f32
    %110 = vector.broadcast %cst_111 : f32 to vector<32x16xf32>
    %111 = arith.mulf %110, %107 : vector<32x16xf32>
    %112 = arith.select %109, %107, %111 : vector<32x16xi1>, vector<32x16xf32>
    %c0_112 = arith.constant 0 : index
    %c0_113 = arith.constant 0 : index
    %c0_114 = arith.constant 0 : index
    %113 = vector.load %arg12[%c0_112, %c0_113, %c0_114] : memref<1x32x16xf32, #tpu.memory_space<vmem>>, vector<1x32x16xf32>
    %114 = vector.shape_cast %113 : vector<1x32x16xf32> to vector<32x16xf32>
    %115 = vector.shape_cast %112 : vector<32x16xf32> to vector<1x32x16xf32>
    tpu.vector_store %arg12[%c0_112, %c0_113, %c0_114], %115 {strides = array<i32>} : memref<1x32x16xf32, #tpu.memory_space<vmem>>, vector<1x32x16xf32>,
    %cst_115 = arith.constant 0.000000e+00 : f32
    %116 = vector.broadcast %cst_115 : f32 to vector<3x16xf32>
    %c0_116 = arith.constant 0 : index
    %c0_117 = arith.constant 0 : index
    %117 = vector.load %arg16[%c0_116, %c0_117] : memref<38x16xf32, #tpu.memory_space<vmem>>, vector<3x16xf32>
    tpu.vector_store %arg16[%c0_116, %c0_117], %116 {strides = array<i32>} : memref<38x16xf32, #tpu.memory_space<vmem>>, vector<3x16xf32>,
    %cst_118 = arith.constant 0.000000e+00 : f32
    %118 = vector.broadcast %cst_118 : f32 to vector<3x16xf32>
    %c35 = arith.constant 35 : index
    %c0_119 = arith.constant 0 : index
    %119 = vector.load %arg16[%c35, %c0_119] : memref<38x16xf32, #tpu.memory_space<vmem>>, vector<3x16xf32>
    tpu.vector_store %arg16[%c35, %c0_119], %118 {strides = array<i32>} : memref<38x16xf32, #tpu.memory_space<vmem>>, vector<3x16xf32>,
    %c3_120 = arith.constant 3 : index
    %c0_121 = arith.constant 0 : index
    %120 = vector.load %arg16[%c3_120, %c0_121] : memref<38x16xf32, #tpu.memory_space<vmem>>, vector<32x16xf32>
    tpu.vector_store %arg16[%c3_120, %c0_121], %112 {strides = array<i32>} : memref<38x16xf32, #tpu.memory_space<vmem>>, vector<32x16xf32>,
    %cst_122 = arith.constant 0.000000e+00 : f32
    %121 = vector.broadcast %cst_122 : f32 to vector<36x8xf32>
    %c0_123 = arith.constant 0 : index
    %c0_124 = arith.constant 0 : index
    %122 = vector.load %arg16[%c0_123, %c0_124] : memref<38x16xf32, #tpu.memory_space<vmem>>, vector<36x16xf32>
    %c0_125 = arith.constant 0 : index
    %c0_126 = arith.constant 0 : index
    %c0_127 = arith.constant 0 : index
    %123 = vector.load %arg8[%c0_125, %c0_126, %c0_127] : memref<3x16x8xf32, #tpu.memory_space<vmem>>, vector<1x16x8xf32>
    %124 = vector.shape_cast %123 : vector<1x16x8xf32> to vector<16x8xf32>
    %cst_128 = arith.constant dense<0.000000e+00> : vector<36x8xf32>
    %125 = tpu.matmul %122, %124, %cst_128 {dimension_numbers = #tpu.dot_dimension_numbers<[1], [0], [0], [1], [0, 0, 1, 1], [], []>} : vector<36x16xf32>, vector<16x8xf32>, vector<36x8xf32> -> vector<36x8xf32>
    %126 = arith.addf %121, %125 : vector<36x8xf32>
    %c1_129 = arith.constant 1 : index
    %c0_130 = arith.constant 0 : index
    %127 = vector.load %arg16[%c1_129, %c0_130] : memref<38x16xf32, #tpu.memory_space<vmem>>, vector<36x16xf32>
    %c1_131 = arith.constant 1 : index
    %c0_132 = arith.constant 0 : index
    %c0_133 = arith.constant 0 : index
    %128 = vector.load %arg8[%c1_131, %c0_132, %c0_133] : memref<3x16x8xf32, #tpu.memory_space<vmem>>, vector<1x16x8xf32>
    %129 = vector.shape_cast %128 : vector<1x16x8xf32> to vector<16x8xf32>
    %cst_134 = arith.constant dense<0.000000e+00> : vector<36x8xf32>
    %130 = tpu.matmul %127, %129, %cst_134 {dimension_numbers = #tpu.dot_dimension_numbers<[1], [0], [0], [1], [0, 0, 1, 1], [], []>} : vector<36x16xf32>, vector<16x8xf32>, vector<36x8xf32> -> vector<36x8xf32>
    %131 = arith.addf %126, %130 : vector<36x8xf32>
    %c2_135 = arith.constant 2 : index
    %c0_136 = arith.constant 0 : index
    %132 = vector.load %arg16[%c2_135, %c0_136] : memref<38x16xf32, #tpu.memory_space<vmem>>, vector<36x16xf32>
    %c2_137 = arith.constant 2 : index
    %c0_138 = arith.constant 0 : index
    %c0_139 = arith.constant 0 : index
    %133 = vector.load %arg8[%c2_137, %c0_138, %c0_139] : memref<3x16x8xf32, #tpu.memory_space<vmem>>, vector<1x16x8xf32>
    %134 = vector.shape_cast %133 : vector<1x16x8xf32> to vector<16x8xf32>
    %cst_140 = arith.constant dense<0.000000e+00> : vector<36x8xf32>
    %135 = tpu.matmul %132, %134, %cst_140 {dimension_numbers = #tpu.dot_dimension_numbers<[1], [0], [0], [1], [0, 0, 1, 1], [], []>} : vector<36x16xf32>, vector<16x8xf32>, vector<36x8xf32> -> vector<36x8xf32>
    %136 = arith.addf %131, %135 : vector<36x8xf32>
    %c0_141 = arith.constant 0 : index
    %c0_142 = arith.constant 0 : index
    %137 = vector.load %arg9[%c0_141, %c0_142] : memref<1x8xf32, #tpu.memory_space<vmem>>, vector<1x8xf32>
    %138 = vector.broadcast %137 : vector<1x8xf32> to vector<36x8xf32>
    %139 = arith.addf %136, %138 : vector<36x8xf32>
    %c0_143 = arith.constant 0 : index
    %c0_144 = arith.constant 0 : index
    %c0_145 = arith.constant 0 : index
    %140 = vector.load %arg13[%c0_143, %c0_144, %c0_145] : memref<1x36x8xf32, #tpu.memory_space<vmem>>, vector<1x36x8xf32>
    %141 = vector.shape_cast %140 : vector<1x36x8xf32> to vector<36x8xf32>
    %142 = vector.shape_cast %139 : vector<36x8xf32> to vector<1x36x8xf32>
    tpu.vector_store %arg13[%c0_143, %c0_144, %c0_145], %142 {strides = array<i32>} : memref<1x36x8xf32, #tpu.memory_space<vmem>>, vector<1x36x8xf32>,
    return
  }
  func.func @transform_0(%arg0: i32) -> (i32, i32, i32) {
    %c0_i32 = arith.constant 0 : i32
    %c0_i32_0 = arith.constant 0 : i32
    %c0_i32_1 = arith.constant 0 : i32
    return %arg0, %c0_i32, %c0_i32_0 : i32, i32, i32
  }
  func.func @transform_1(%arg0: i32) -> (i32, i32, i32) {
    %c0_i32 = arith.constant 0 : i32
    %c0_i32_0 = arith.constant 0 : i32
    %c0_i32_1 = arith.constant 0 : i32
    %c0_i32_2 = arith.constant 0 : i32
    return %c0_i32, %c0_i32_0, %c0_i32_1 : i32, i32, i32
  }
  func.func @transform_2(%arg0: i32) -> (i32, i32) {
    %c0_i32 = arith.constant 0 : i32
    %c0_i32_0 = arith.constant 0 : i32
    %c0_i32_1 = arith.constant 0 : i32
    return %c0_i32, %c0_i32_0 : i32, i32
  }
  func.func @transform_3(%arg0: i32) -> (i32, i32, i32) {
    %c0_i32 = arith.constant 0 : i32
    %c0_i32_0 = arith.constant 0 : i32
    %c0_i32_1 = arith.constant 0 : i32
    %c0_i32_2 = arith.constant 0 : i32
    return %c0_i32, %c0_i32_0, %c0_i32_1 : i32, i32, i32
  }
  func.func @transform_4(%arg0: i32) -> (i32, i32) {
    %c0_i32 = arith.constant 0 : i32
    %c0_i32_0 = arith.constant 0 : i32
    %c0_i32_1 = arith.constant 0 : i32
    return %c0_i32, %c0_i32_0 : i32, i32
  }
  func.func @transform_5(%arg0: i32) -> (i32, i32, i32) {
    %c0_i32 = arith.constant 0 : i32
    %c0_i32_0 = arith.constant 0 : i32
    %c0_i32_1 = arith.constant 0 : i32
    %c0_i32_2 = arith.constant 0 : i32
    return %c0_i32, %c0_i32_0, %c0_i32_1 : i32, i32, i32
  }
  func.func @transform_6(%arg0: i32) -> (i32, i32) {
    %c0_i32 = arith.constant 0 : i32
    %c0_i32_0 = arith.constant 0 : i32
    %c0_i32_1 = arith.constant 0 : i32
    return %c0_i32, %c0_i32_0 : i32, i32
  }
  func.func @transform_7(%arg0: i32) -> (i32, i32, i32) {
    %c0_i32 = arith.constant 0 : i32
    %c0_i32_0 = arith.constant 0 : i32
    %c0_i32_1 = arith.constant 0 : i32
    %c0_i32_2 = arith.constant 0 : i32
    return %c0_i32, %c0_i32_0, %c0_i32_1 : i32, i32, i32
  }
  func.func @transform_8(%arg0: i32) -> (i32, i32) {
    %c0_i32 = arith.constant 0 : i32
    %c0_i32_0 = arith.constant 0 : i32
    %c0_i32_1 = arith.constant 0 : i32
    return %c0_i32, %c0_i32_0 : i32, i32
  }
  func.func @transform_9(%arg0: i32) -> (i32, i32, i32) {
    %c0_i32 = arith.constant 0 : i32
    %c0_i32_0 = arith.constant 0 : i32
    %c0_i32_1 = arith.constant 0 : i32
    return %arg0, %c0_i32, %c0_i32_0 : i32, i32, i32
  }
  func.func @transform_10(%arg0: i32) -> (i32, i32, i32) {
    %c0_i32 = arith.constant 0 : i32
    %c0_i32_0 = arith.constant 0 : i32
    %c0_i32_1 = arith.constant 0 : i32
    return %arg0, %c0_i32, %c0_i32_0 : i32, i32, i32
  }
  func.func @transform_11(%arg0: i32) -> (i32, i32, i32) {
    %c0_i32 = arith.constant 0 : i32
    %c0_i32_0 = arith.constant 0 : i32
    %c0_i32_1 = arith.constant 0 : i32
    return %arg0, %c0_i32, %c0_i32_0 : i32, i32, i32
  }
  func.func @transform_12(%arg0: i32) -> (i32, i32, i32) {
    %c0_i32 = arith.constant 0 : i32
    %c0_i32_0 = arith.constant 0 : i32
    %c0_i32_1 = arith.constant 0 : i32
    return %arg0, %c0_i32, %c0_i32_0 : i32, i32, i32
  }
}

module attributes {stable_mosaic.version = 11 : i64} {
  func.func @_fused_chain_kernel(%arg0: i32, %arg1: memref<1x37x8xf32, #tpu.memory_space<vmem>>, %arg2: memref<5x8x16xf32, #tpu.memory_space<vmem>>, %arg3: memref<1x16xf32, #tpu.memory_space<vmem>>, %arg4: memref<5x16x32xf32, #tpu.memory_space<vmem>>, %arg5: memref<1x32xf32, #tpu.memory_space<vmem>>, %arg6: memref<3x32x32xf32, #tpu.memory_space<vmem>>, %arg7: memref<1x32xf32, #tpu.memory_space<vmem>>, %arg8: memref<3x32x8xf32, #tpu.memory_space<vmem>>, %arg9: memref<1x8xf32, #tpu.memory_space<vmem>>, %arg10: memref<1x33x16xf32, #tpu.memory_space<vmem>>, %arg11: memref<1x17x32xf32, #tpu.memory_space<vmem>>, %arg12: memref<1x17x32xf32, #tpu.memory_space<vmem>>, %arg13: memref<1x21x8xf32, #tpu.memory_space<vmem>>, %arg14: memref<37x16xf32, #tpu.memory_space<vmem>>, %arg15: memref<19x32xf32, #tpu.memory_space<vmem>>, %arg16: memref<23x32xf32, #tpu.memory_space<vmem>>) attributes {dimension_semantics = [#tpu.dimension_semantics<parallel>], iteration_bounds = array<i64: 4>, scalar_prefetch = 0 : i64, scratch_operands = 3 : i64, tpu.core_type = #tpu.core_type<tc>, window_params = [{transform_indices = @transform_0, window_bounds = array<i64: 1, 37, 8>}, {pipeline_mode = #tpu.pipeline_mode<synchronous>, transform_indices = @transform_1, window_bounds = array<i64: 5, 8, 16>}, {pipeline_mode = #tpu.pipeline_mode<synchronous>, transform_indices = @transform_2, window_bounds = array<i64: 1, 16>}, {pipeline_mode = #tpu.pipeline_mode<synchronous>, transform_indices = @transform_3, window_bounds = array<i64: 5, 16, 32>}, {pipeline_mode = #tpu.pipeline_mode<synchronous>, transform_indices = @transform_4, window_bounds = array<i64: 1, 32>}, {pipeline_mode = #tpu.pipeline_mode<synchronous>, transform_indices = @transform_5, window_bounds = array<i64: 3, 32, 32>}, {pipeline_mode = #tpu.pipeline_mode<synchronous>, transform_indices = @transform_6, window_bounds = array<i64: 1, 32>}, {pipeline_mode = #tpu.pipeline_mode<synchronous>, transform_indices = @transform_7, window_bounds = array<i64: 3, 32, 8>}, {pipeline_mode = #tpu.pipeline_mode<synchronous>, transform_indices = @transform_8, window_bounds = array<i64: 1, 8>}, {transform_indices = @transform_9, window_bounds = array<i64: 1, 33, 16>}, {transform_indices = @transform_10, window_bounds = array<i64: 1, 17, 32>}, {transform_indices = @transform_11, window_bounds = array<i64: 1, 17, 32>}, {transform_indices = @transform_12, window_bounds = array<i64: 1, 21, 8>}]} {
    %cst = arith.constant 0.000000e+00 : f32
    %0 = vector.broadcast %cst : f32 to vector<33x16xf32>
    %c0 = arith.constant 0 : index
    %c0_0 = arith.constant 0 : index
    %c0_1 = arith.constant 0 : index
    %1 = vector.load %arg1[%c0, %c0_0, %c0_1] : memref<1x37x8xf32, #tpu.memory_space<vmem>>, vector<1x33x8xf32>
    %2 = vector.shape_cast %1 : vector<1x33x8xf32> to vector<33x8xf32>
    %c0_2 = arith.constant 0 : index
    %c0_3 = arith.constant 0 : index
    %c0_4 = arith.constant 0 : index
    %3 = vector.load %arg2[%c0_2, %c0_3, %c0_4] : memref<5x8x16xf32, #tpu.memory_space<vmem>>, vector<1x8x16xf32>
    %4 = vector.shape_cast %3 : vector<1x8x16xf32> to vector<8x16xf32>
    %cst_5 = arith.constant dense<0.000000e+00> : vector<33x16xf32>
    %5 = tpu.matmul %2, %4, %cst_5 {dimension_numbers = #tpu.dot_dimension_numbers<[1], [0], [0], [1], [0, 0, 1, 1], [], []>} : vector<33x8xf32>, vector<8x16xf32>, vector<33x16xf32> -> vector<33x16xf32>
    %6 = arith.addf %0, %5 : vector<33x16xf32>
    %c0_6 = arith.constant 0 : index
    %c1 = arith.constant 1 : index
    %c0_7 = arith.constant 0 : index
    %7 = vector.load %arg1[%c0_6, %c1, %c0_7] : memref<1x37x8xf32, #tpu.memory_space<vmem>>, vector<1x33x8xf32>
    %8 = vector.shape_cast %7 : vector<1x33x8xf32> to vector<33x8xf32>
    %c1_8 = arith.constant 1 : index
    %c0_9 = arith.constant 0 : index
    %c0_10 = arith.constant 0 : index
    %9 = vector.load %arg2[%c1_8, %c0_9, %c0_10] : memref<5x8x16xf32, #tpu.memory_space<vmem>>, vector<1x8x16xf32>
    %10 = vector.shape_cast %9 : vector<1x8x16xf32> to vector<8x16xf32>
    %cst_11 = arith.constant dense<0.000000e+00> : vector<33x16xf32>
    %11 = tpu.matmul %8, %10, %cst_11 {dimension_numbers = #tpu.dot_dimension_numbers<[1], [0], [0], [1], [0, 0, 1, 1], [], []>} : vector<33x8xf32>, vector<8x16xf32>, vector<33x16xf32> -> vector<33x16xf32>
    %12 = arith.addf %6, %11 : vector<33x16xf32>
    %c0_12 = arith.constant 0 : index
    %c2 = arith.constant 2 : index
    %c0_13 = arith.constant 0 : index
    %13 = vector.load %arg1[%c0_12, %c2, %c0_13] : memref<1x37x8xf32, #tpu.memory_space<vmem>>, vector<1x33x8xf32>
    %14 = vector.shape_cast %13 : vector<1x33x8xf32> to vector<33x8xf32>
    %c2_14 = arith.constant 2 : index
    %c0_15 = arith.constant 0 : index
    %c0_16 = arith.constant 0 : index
    %15 = vector.load %arg2[%c2_14, %c0_15, %c0_16] : memref<5x8x16xf32, #tpu.memory_space<vmem>>, vector<1x8x16xf32>
    %16 = vector.shape_cast %15 : vector<1x8x16xf32> to vector<8x16xf32>
    %cst_17 = arith.constant dense<0.000000e+00> : vector<33x16xf32>
    %17 = tpu.matmul %14, %16, %cst_17 {dimension_numbers = #tpu.dot_dimension_numbers<[1], [0], [0], [1], [0, 0, 1, 1], [], []>} : vector<33x8xf32>, vector<8x16xf32>, vector<33x16xf32> -> vector<33x16xf32>
    %18 = arith.addf %12, %17 : vector<33x16xf32>
    %c0_18 = arith.constant 0 : index
    %c3 = arith.constant 3 : index
    %c0_19 = arith.constant 0 : index
    %19 = vector.load %arg1[%c0_18, %c3, %c0_19] : memref<1x37x8xf32, #tpu.memory_space<vmem>>, vector<1x33x8xf32>
    %20 = vector.shape_cast %19 : vector<1x33x8xf32> to vector<33x8xf32>
    %c3_20 = arith.constant 3 : index
    %c0_21 = arith.constant 0 : index
    %c0_22 = arith.constant 0 : index
    %21 = vector.load %arg2[%c3_20, %c0_21, %c0_22] : memref<5x8x16xf32, #tpu.memory_space<vmem>>, vector<1x8x16xf32>
    %22 = vector.shape_cast %21 : vector<1x8x16xf32> to vector<8x16xf32>
    %cst_23 = arith.constant dense<0.000000e+00> : vector<33x16xf32>
    %23 = tpu.matmul %20, %22, %cst_23 {dimension_numbers = #tpu.dot_dimension_numbers<[1], [0], [0], [1], [0, 0, 1, 1], [], []>} : vector<33x8xf32>, vector<8x16xf32>, vector<33x16xf32> -> vector<33x16xf32>
    %24 = arith.addf %18, %23 : vector<33x16xf32>
    %c0_24 = arith.constant 0 : index
    %c4 = arith.constant 4 : index
    %c0_25 = arith.constant 0 : index
    %25 = vector.load %arg1[%c0_24, %c4, %c0_25] : memref<1x37x8xf32, #tpu.memory_space<vmem>>, vector<1x33x8xf32>
    %26 = vector.shape_cast %25 : vector<1x33x8xf32> to vector<33x8xf32>
    %c4_26 = arith.constant 4 : index
    %c0_27 = arith.constant 0 : index
    %c0_28 = arith.constant 0 : index
    %27 = vector.load %arg2[%c4_26, %c0_27, %c0_28] : memref<5x8x16xf32, #tpu.memory_space<vmem>>, vector<1x8x16xf32>
    %28 = vector.shape_cast %27 : vector<1x8x16xf32> to vector<8x16xf32>
    %cst_29 = arith.constant dense<0.000000e+00> : vector<33x16xf32>
    %29 = tpu.matmul %26, %28, %cst_29 {dimension_numbers = #tpu.dot_dimension_numbers<[1], [0], [0], [1], [0, 0, 1, 1], [], []>} : vector<33x8xf32>, vector<8x16xf32>, vector<33x16xf32> -> vector<33x16xf32>
    %30 = arith.addf %24, %29 : vector<33x16xf32>
    %c0_30 = arith.constant 0 : index
    %c0_31 = arith.constant 0 : index
    %31 = vector.load %arg3[%c0_30, %c0_31] : memref<1x16xf32, #tpu.memory_space<vmem>>, vector<1x16xf32>
    %32 = vector.broadcast %31 : vector<1x16xf32> to vector<33x16xf32>
    %33 = arith.addf %30, %32 : vector<33x16xf32>
    %cst_32 = arith.constant 0.000000e+00 : f32
    %34 = vector.broadcast %cst_32 : f32 to vector<33x16xf32>
    %35 = arith.cmpf oge, %33, %34 : vector<33x16xf32>
    %cst_33 = arith.constant 1.000000e-01 : f32
    %36 = vector.broadcast %cst_33 : f32 to vector<33x16xf32>
    %37 = arith.mulf %36, %33 : vector<33x16xf32>
    %38 = arith.select %35, %33, %37 : vector<33x16xi1>, vector<33x16xf32>
    %c0_34 = arith.constant 0 : index
    %c0_35 = arith.constant 0 : index
    %c0_36 = arith.constant 0 : index
    %39 = vector.load %arg10[%c0_34, %c0_35, %c0_36] : memref<1x33x16xf32, #tpu.memory_space<vmem>>, vector<1x33x16xf32>
    %40 = vector.shape_cast %39 : vector<1x33x16xf32> to vector<33x16xf32>
    %41 = vector.shape_cast %38 : vector<33x16xf32> to vector<1x33x16xf32>
    tpu.vector_store %arg10[%c0_34, %c0_35, %c0_36], %41 {strides = array<i32>} : memref<1x33x16xf32, #tpu.memory_space<vmem>>, vector<1x33x16xf32>,
    %cst_37 = arith.constant 0.000000e+00 : f32
    %42 = vector.broadcast %cst_37 : f32 to vector<2x16xf32>
    %c0_38 = arith.constant 0 : index
    %c0_39 = arith.constant 0 : index
    %43 = vector.load %arg14[%c0_38, %c0_39] : memref<37x16xf32, #tpu.memory_space<vmem>>, vector<2x16xf32>
    tpu.vector_store %arg14[%c0_38, %c0_39], %42 {strides = array<i32>} : memref<37x16xf32, #tpu.memory_space<vmem>>, vector<2x16xf32>,
    %cst_40 = arith.constant 0.000000e+00 : f32
    %44 = vector.broadcast %cst_40 : f32 to vector<2x16xf32>
    %c35 = arith.constant 35 : index
    %c0_41 = arith.constant 0 : index
    %45 = vector.load %arg14[%c35, %c0_41] : memref<37x16xf32, #tpu.memory_space<vmem>>, vector<2x16xf32>
    tpu.vector_store %arg14[%c35, %c0_41], %44 {strides = array<i32>} : memref<37x16xf32, #tpu.memory_space<vmem>>, vector<2x16xf32>,
    %c2_42 = arith.constant 2 : index
    %c0_43 = arith.constant 0 : index
    %46 = vector.load %arg14[%c2_42, %c0_43] : memref<37x16xf32, #tpu.memory_space<vmem>>, vector<33x16xf32>
    tpu.vector_store %arg14[%c2_42, %c0_43], %38 {strides = array<i32>} : memref<37x16xf32, #tpu.memory_space<vmem>>, vector<33x16xf32>,
    %cst_44 = arith.constant 0.000000e+00 : f32
    %47 = vector.broadcast %cst_44 : f32 to vector<17x32xf32>
    %c0_45 = arith.constant 0 : index
    %c0_46 = arith.constant 0 : index
    %48 = tpu.strided_load %arg14[%c0_45, %c0_46] {strides = array<i32: 2, 1>} : memref<37x16xf32, #tpu.memory_space<vmem>>, vector<17x16xf32>
    %c0_47 = arith.constant 0 : index
    %c0_48 = arith.constant 0 : index
    %c0_49 = arith.constant 0 : index
    %49 = vector.load %arg4[%c0_47, %c0_48, %c0_49] : memref<5x16x32xf32, #tpu.memory_space<vmem>>, vector<1x16x32xf32>
    %50 = vector.shape_cast %49 : vector<1x16x32xf32> to vector<16x32xf32>
    %cst_50 = arith.constant dense<0.000000e+00> : vector<17x32xf32>
    %51 = tpu.matmul %48, %50, %cst_50 {dimension_numbers = #tpu.dot_dimension_numbers<[1], [0], [0], [1], [0, 0, 1, 1], [], []>} : vector<17x16xf32>, vector<16x32xf32>, vector<17x32xf32> -> vector<17x32xf32>
    %52 = arith.addf %47, %51 : vector<17x32xf32>
    %c1_51 = arith.constant 1 : index
    %c0_52 = arith.constant 0 : index
    %53 = tpu.strided_load %arg14[%c1_51, %c0_52] {strides = array<i32: 2, 1>} : memref<37x16xf32, #tpu.memory_space<vmem>>, vector<17x16xf32>
    %c1_53 = arith.constant 1 : index
    %c0_54 = arith.constant 0 : index
    %c0_55 = arith.constant 0 : index
    %54 = vector.load %arg4[%c1_53, %c0_54, %c0_55] : memref<5x16x32xf32, #tpu.memory_space<vmem>>, vector<1x16x32xf32>
    %55 = vector.shape_cast %54 : vector<1x16x32xf32> to vector<16x32xf32>
    %cst_56 = arith.constant dense<0.000000e+00> : vector<17x32xf32>
    %56 = tpu.matmul %53, %55, %cst_56 {dimension_numbers = #tpu.dot_dimension_numbers<[1], [0], [0], [1], [0, 0, 1, 1], [], []>} : vector<17x16xf32>, vector<16x32xf32>, vector<17x32xf32> -> vector<17x32xf32>
    %57 = arith.addf %52, %56 : vector<17x32xf32>
    %c2_57 = arith.constant 2 : index
    %c0_58 = arith.constant 0 : index
    %58 = tpu.strided_load %arg14[%c2_57, %c0_58] {strides = array<i32: 2, 1>} : memref<37x16xf32, #tpu.memory_space<vmem>>, vector<17x16xf32>
    %c2_59 = arith.constant 2 : index
    %c0_60 = arith.constant 0 : index
    %c0_61 = arith.constant 0 : index
    %59 = vector.load %arg4[%c2_59, %c0_60, %c0_61] : memref<5x16x32xf32, #tpu.memory_space<vmem>>, vector<1x16x32xf32>
    %60 = vector.shape_cast %59 : vector<1x16x32xf32> to vector<16x32xf32>
    %cst_62 = arith.constant dense<0.000000e+00> : vector<17x32xf32>
    %61 = tpu.matmul %58, %60, %cst_62 {dimension_numbers = #tpu.dot_dimension_numbers<[1], [0], [0], [1], [0, 0, 1, 1], [], []>} : vector<17x16xf32>, vector<16x32xf32>, vector<17x32xf32> -> vector<17x32xf32>
    %62 = arith.addf %57, %61 : vector<17x32xf32>
    %c3_63 = arith.constant 3 : index
    %c0_64 = arith.constant 0 : index
    %63 = tpu.strided_load %arg14[%c3_63, %c0_64] {strides = array<i32: 2, 1>} : memref<37x16xf32, #tpu.memory_space<vmem>>, vector<17x16xf32>
    %c3_65 = arith.constant 3 : index
    %c0_66 = arith.constant 0 : index
    %c0_67 = arith.constant 0 : index
    %64 = vector.load %arg4[%c3_65, %c0_66, %c0_67] : memref<5x16x32xf32, #tpu.memory_space<vmem>>, vector<1x16x32xf32>
    %65 = vector.shape_cast %64 : vector<1x16x32xf32> to vector<16x32xf32>
    %cst_68 = arith.constant dense<0.000000e+00> : vector<17x32xf32>
    %66 = tpu.matmul %63, %65, %cst_68 {dimension_numbers = #tpu.dot_dimension_numbers<[1], [0], [0], [1], [0, 0, 1, 1], [], []>} : vector<17x16xf32>, vector<16x32xf32>, vector<17x32xf32> -> vector<17x32xf32>
    %67 = arith.addf %62, %66 : vector<17x32xf32>
    %c4_69 = arith.constant 4 : index
    %c0_70 = arith.constant 0 : index
    %68 = tpu.strided_load %arg14[%c4_69, %c0_70] {strides = array<i32: 2, 1>} : memref<37x16xf32, #tpu.memory_space<vmem>>, vector<17x16xf32>
    %c4_71 = arith.constant 4 : index
    %c0_72 = arith.constant 0 : index
    %c0_73 = arith.constant 0 : index
    %69 = vector.load %arg4[%c4_71, %c0_72, %c0_73] : memref<5x16x32xf32, #tpu.memory_space<vmem>>, vector<1x16x32xf32>
    %70 = vector.shape_cast %69 : vector<1x16x32xf32> to vector<16x32xf32>
    %cst_74 = arith.constant dense<0.000000e+00> : vector<17x32xf32>
    %71 = tpu.matmul %68, %70, %cst_74 {dimension_numbers = #tpu.dot_dimension_numbers<[1], [0], [0], [1], [0, 0, 1, 1], [], []>} : vector<17x16xf32>, vector<16x32xf32>, vector<17x32xf32> -> vector<17x32xf32>
    %72 = arith.addf %67, %71 : vector<17x32xf32>
    %c0_75 = arith.constant 0 : index
    %c0_76 = arith.constant 0 : index
    %73 = vector.load %arg5[%c0_75, %c0_76] : memref<1x32xf32, #tpu.memory_space<vmem>>, vector<1x32xf32>
    %74 = vector.broadcast %73 : vector<1x32xf32> to vector<17x32xf32>
    %75 = arith.addf %72, %74 : vector<17x32xf32>
    %cst_77 = arith.constant 0.000000e+00 : f32
    %76 = vector.broadcast %cst_77 : f32 to vector<17x32xf32>
    %77 = arith.cmpf oge, %75, %76 : vector<17x32xf32>
    %cst_78 = arith.constant 1.000000e-01 : f32
    %78 = vector.broadcast %cst_78 : f32 to vector<17x32xf32>
    %79 = arith.mulf %78, %75 : vector<17x32xf32>
    %80 = arith.select %77, %75, %79 : vector<17x32xi1>, vector<17x32xf32>
    %c0_79 = arith.constant 0 : index
    %c0_80 = arith.constant 0 : index
    %c0_81 = arith.constant 0 : index
    %81 = vector.load %arg11[%c0_79, %c0_80, %c0_81] : memref<1x17x32xf32, #tpu.memory_space<vmem>>, vector<1x17x32xf32>
    %82 = vector.shape_cast %81 : vector<1x17x32xf32> to vector<17x32xf32>
    %83 = vector.shape_cast %80 : vector<17x32xf32> to vector<1x17x32xf32>
    tpu.vector_store %arg11[%c0_79, %c0_80, %c0_81], %83 {strides = array<i32>} : memref<1x17x32xf32, #tpu.memory_space<vmem>>, vector<1x17x32xf32>,
    %cst_82 = arith.constant 0.000000e+00 : f32
    %84 = vector.broadcast %cst_82 : f32 to vector<1x32xf32>
    %c0_83 = arith.constant 0 : index
    %c0_84 = arith.constant 0 : index
    %85 = vector.load %arg15[%c0_83, %c0_84] : memref<19x32xf32, #tpu.memory_space<vmem>>, vector<1x32xf32>
    tpu.vector_store %arg15[%c0_83, %c0_84], %84 {strides = array<i32>} : memref<19x32xf32, #tpu.memory_space<vmem>>, vector<1x32xf32>,
    %cst_85 = arith.constant 0.000000e+00 : f32
    %86 = vector.broadcast %cst_85 : f32 to vector<1x32xf32>
    %c18 = arith.constant 18 : index
    %c0_86 = arith.constant 0 : index
    %87 = vector.load %arg15[%c18, %c0_86] : memref<19x32xf32, #tpu.memory_space<vmem>>, vector<1x32xf32>
    tpu.vector_store %arg15[%c18, %c0_86], %86 {strides = array<i32>} : memref<19x32xf32, #tpu.memory_space<vmem>>, vector<1x32xf32>,
    %c1_87 = arith.constant 1 : index
    %c0_88 = arith.constant 0 : index
    %88 = vector.load %arg15[%c1_87, %c0_88] : memref<19x32xf32, #tpu.memory_space<vmem>>, vector<17x32xf32>
    tpu.vector_store %arg15[%c1_87, %c0_88], %80 {strides = array<i32>} : memref<19x32xf32, #tpu.memory_space<vmem>>, vector<17x32xf32>,
    %cst_89 = arith.constant 0.000000e+00 : f32
    %89 = vector.broadcast %cst_89 : f32 to vector<17x32xf32>
    %c0_90 = arith.constant 0 : index
    %c0_91 = arith.constant 0 : index
    %90 = vector.load %arg15[%c0_90, %c0_91] : memref<19x32xf32, #tpu.memory_space<vmem>>, vector<17x32xf32>
    %c0_92 = arith.constant 0 : index
    %c0_93 = arith.constant 0 : index
    %c0_94 = arith.constant 0 : index
    %91 = vector.load %arg6[%c0_92, %c0_93, %c0_94] : memref<3x32x32xf32, #tpu.memory_space<vmem>>, vector<1x32x32xf32>
    %92 = vector.shape_cast %91 : vector<1x32x32xf32> to vector<32x32xf32>
    %cst_95 = arith.constant dense<0.000000e+00> : vector<17x32xf32>
    %93 = tpu.matmul %90, %92, %cst_95 {dimension_numbers = #tpu.dot_dimension_numbers<[1], [0], [0], [1], [0, 0, 1, 1], [], []>} : vector<17x32xf32>, vector<32x32xf32>, vector<17x32xf32> -> vector<17x32xf32>
    %94 = arith.addf %89, %93 : vector<17x32xf32>
    %c1_96 = arith.constant 1 : index
    %c0_97 = arith.constant 0 : index
    %95 = vector.load %arg15[%c1_96, %c0_97] : memref<19x32xf32, #tpu.memory_space<vmem>>, vector<17x32xf32>
    %c1_98 = arith.constant 1 : index
    %c0_99 = arith.constant 0 : index
    %c0_100 = arith.constant 0 : index
    %96 = vector.load %arg6[%c1_98, %c0_99, %c0_100] : memref<3x32x32xf32, #tpu.memory_space<vmem>>, vector<1x32x32xf32>
    %97 = vector.shape_cast %96 : vector<1x32x32xf32> to vector<32x32xf32>
    %cst_101 = arith.constant dense<0.000000e+00> : vector<17x32xf32>
    %98 = tpu.matmul %95, %97, %cst_101 {dimension_numbers = #tpu.dot_dimension_numbers<[1], [0], [0], [1], [0, 0, 1, 1], [], []>} : vector<17x32xf32>, vector<32x32xf32>, vector<17x32xf32> -> vector<17x32xf32>
    %99 = arith.addf %94, %98 : vector<17x32xf32>
    %c2_102 = arith.constant 2 : index
    %c0_103 = arith.constant 0 : index
    %100 = vector.load %arg15[%c2_102, %c0_103] : memref<19x32xf32, #tpu.memory_space<vmem>>, vector<17x32xf32>
    %c2_104 = arith.constant 2 : index
    %c0_105 = arith.constant 0 : index
    %c0_106 = arith.constant 0 : index
    %101 = vector.load %arg6[%c2_104, %c0_105, %c0_106] : memref<3x32x32xf32, #tpu.memory_space<vmem>>, vector<1x32x32xf32>
    %102 = vector.shape_cast %101 : vector<1x32x32xf32> to vector<32x32xf32>
    %cst_107 = arith.constant dense<0.000000e+00> : vector<17x32xf32>
    %103 = tpu.matmul %100, %102, %cst_107 {dimension_numbers = #tpu.dot_dimension_numbers<[1], [0], [0], [1], [0, 0, 1, 1], [], []>} : vector<17x32xf32>, vector<32x32xf32>, vector<17x32xf32> -> vector<17x32xf32>
    %104 = arith.addf %99, %103 : vector<17x32xf32>
    %c0_108 = arith.constant 0 : index
    %c0_109 = arith.constant 0 : index
    %105 = vector.load %arg7[%c0_108, %c0_109] : memref<1x32xf32, #tpu.memory_space<vmem>>, vector<1x32xf32>
    %106 = vector.broadcast %105 : vector<1x32xf32> to vector<17x32xf32>
    %107 = arith.addf %104, %106 : vector<17x32xf32>
    %cst_110 = arith.constant 0.000000e+00 : f32
    %108 = vector.broadcast %cst_110 : f32 to vector<17x32xf32>
    %109 = arith.cmpf oge, %107, %108 : vector<17x32xf32>
    %cst_111 = arith.constant 1.000000e-01 : f32
    %110 = vector.broadcast %cst_111 : f32 to vector<17x32xf32>
    %111 = arith.mulf %110, %107 : vector<17x32xf32>
    %112 = arith.select %109, %107, %111 : vector<17x32xi1>, vector<17x32xf32>
    %c0_112 = arith.constant 0 : index
    %c0_113 = arith.constant 0 : index
    %c0_114 = arith.constant 0 : index
    %113 = vector.load %arg12[%c0_112, %c0_113, %c0_114] : memref<1x17x32xf32, #tpu.memory_space<vmem>>, vector<1x17x32xf32>
    %114 = vector.shape_cast %113 : vector<1x17x32xf32> to vector<17x32xf32>
    %115 = vector.shape_cast %112 : vector<17x32xf32> to vector<1x17x32xf32>
    tpu.vector_store %arg12[%c0_112, %c0_113, %c0_114], %115 {strides = array<i32>} : memref<1x17x32xf32, #tpu.memory_space<vmem>>, vector<1x17x32xf32>,
    %cst_115 = arith.constant 0.000000e+00 : f32
    %116 = vector.broadcast %cst_115 : f32 to vector<3x32xf32>
    %c0_116 = arith.constant 0 : index
    %c0_117 = arith.constant 0 : index
    %117 = vector.load %arg16[%c0_116, %c0_117] : memref<23x32xf32, #tpu.memory_space<vmem>>, vector<3x32xf32>
    tpu.vector_store %arg16[%c0_116, %c0_117], %116 {strides = array<i32>} : memref<23x32xf32, #tpu.memory_space<vmem>>, vector<3x32xf32>,
    %cst_118 = arith.constant 0.000000e+00 : f32
    %118 = vector.broadcast %cst_118 : f32 to vector<3x32xf32>
    %c20 = arith.constant 20 : index
    %c0_119 = arith.constant 0 : index
    %119 = vector.load %arg16[%c20, %c0_119] : memref<23x32xf32, #tpu.memory_space<vmem>>, vector<3x32xf32>
    tpu.vector_store %arg16[%c20, %c0_119], %118 {strides = array<i32>} : memref<23x32xf32, #tpu.memory_space<vmem>>, vector<3x32xf32>,
    %c3_120 = arith.constant 3 : index
    %c0_121 = arith.constant 0 : index
    %120 = vector.load %arg16[%c3_120, %c0_121] : memref<23x32xf32, #tpu.memory_space<vmem>>, vector<17x32xf32>
    tpu.vector_store %arg16[%c3_120, %c0_121], %112 {strides = array<i32>} : memref<23x32xf32, #tpu.memory_space<vmem>>, vector<17x32xf32>,
    %cst_122 = arith.constant 0.000000e+00 : f32
    %121 = vector.broadcast %cst_122 : f32 to vector<21x8xf32>
    %c0_123 = arith.constant 0 : index
    %c0_124 = arith.constant 0 : index
    %122 = vector.load %arg16[%c0_123, %c0_124] : memref<23x32xf32, #tpu.memory_space<vmem>>, vector<21x32xf32>
    %c0_125 = arith.constant 0 : index
    %c0_126 = arith.constant 0 : index
    %c0_127 = arith.constant 0 : index
    %123 = vector.load %arg8[%c0_125, %c0_126, %c0_127] : memref<3x32x8xf32, #tpu.memory_space<vmem>>, vector<1x32x8xf32>
    %124 = vector.shape_cast %123 : vector<1x32x8xf32> to vector<32x8xf32>
    %cst_128 = arith.constant dense<0.000000e+00> : vector<21x8xf32>
    %125 = tpu.matmul %122, %124, %cst_128 {dimension_numbers = #tpu.dot_dimension_numbers<[1], [0], [0], [1], [0, 0, 1, 1], [], []>} : vector<21x32xf32>, vector<32x8xf32>, vector<21x8xf32> -> vector<21x8xf32>
    %126 = arith.addf %121, %125 : vector<21x8xf32>
    %c1_129 = arith.constant 1 : index
    %c0_130 = arith.constant 0 : index
    %127 = vector.load %arg16[%c1_129, %c0_130] : memref<23x32xf32, #tpu.memory_space<vmem>>, vector<21x32xf32>
    %c1_131 = arith.constant 1 : index
    %c0_132 = arith.constant 0 : index
    %c0_133 = arith.constant 0 : index
    %128 = vector.load %arg8[%c1_131, %c0_132, %c0_133] : memref<3x32x8xf32, #tpu.memory_space<vmem>>, vector<1x32x8xf32>
    %129 = vector.shape_cast %128 : vector<1x32x8xf32> to vector<32x8xf32>
    %cst_134 = arith.constant dense<0.000000e+00> : vector<21x8xf32>
    %130 = tpu.matmul %127, %129, %cst_134 {dimension_numbers = #tpu.dot_dimension_numbers<[1], [0], [0], [1], [0, 0, 1, 1], [], []>} : vector<21x32xf32>, vector<32x8xf32>, vector<21x8xf32> -> vector<21x8xf32>
    %131 = arith.addf %126, %130 : vector<21x8xf32>
    %c2_135 = arith.constant 2 : index
    %c0_136 = arith.constant 0 : index
    %132 = vector.load %arg16[%c2_135, %c0_136] : memref<23x32xf32, #tpu.memory_space<vmem>>, vector<21x32xf32>
    %c2_137 = arith.constant 2 : index
    %c0_138 = arith.constant 0 : index
    %c0_139 = arith.constant 0 : index
    %133 = vector.load %arg8[%c2_137, %c0_138, %c0_139] : memref<3x32x8xf32, #tpu.memory_space<vmem>>, vector<1x32x8xf32>
    %134 = vector.shape_cast %133 : vector<1x32x8xf32> to vector<32x8xf32>
    %cst_140 = arith.constant dense<0.000000e+00> : vector<21x8xf32>
    %135 = tpu.matmul %132, %134, %cst_140 {dimension_numbers = #tpu.dot_dimension_numbers<[1], [0], [0], [1], [0, 0, 1, 1], [], []>} : vector<21x32xf32>, vector<32x8xf32>, vector<21x8xf32> -> vector<21x8xf32>
    %136 = arith.addf %131, %135 : vector<21x8xf32>
    %c0_141 = arith.constant 0 : index
    %c0_142 = arith.constant 0 : index
    %137 = vector.load %arg9[%c0_141, %c0_142] : memref<1x8xf32, #tpu.memory_space<vmem>>, vector<1x8xf32>
    %138 = vector.broadcast %137 : vector<1x8xf32> to vector<21x8xf32>
    %139 = arith.addf %136, %138 : vector<21x8xf32>
    %c0_143 = arith.constant 0 : index
    %c0_144 = arith.constant 0 : index
    %c0_145 = arith.constant 0 : index
    %140 = vector.load %arg13[%c0_143, %c0_144, %c0_145] : memref<1x21x8xf32, #tpu.memory_space<vmem>>, vector<1x21x8xf32>
    %141 = vector.shape_cast %140 : vector<1x21x8xf32> to vector<21x8xf32>
    %142 = vector.shape_cast %139 : vector<21x8xf32> to vector<1x21x8xf32>
    tpu.vector_store %arg13[%c0_143, %c0_144, %c0_145], %142 {strides = array<i32>} : memref<1x21x8xf32, #tpu.memory_space<vmem>>, vector<1x21x8xf32>,
    return
  }
  func.func @transform_0(%arg0: i32) -> (i32, i32, i32) {
    %c0_i32 = arith.constant 0 : i32
    %c0_i32_0 = arith.constant 0 : i32
    %c0_i32_1 = arith.constant 0 : i32
    return %arg0, %c0_i32, %c0_i32_0 : i32, i32, i32
  }
  func.func @transform_1(%arg0: i32) -> (i32, i32, i32) {
    %c0_i32 = arith.constant 0 : i32
    %c0_i32_0 = arith.constant 0 : i32
    %c0_i32_1 = arith.constant 0 : i32
    %c0_i32_2 = arith.constant 0 : i32
    return %c0_i32, %c0_i32_0, %c0_i32_1 : i32, i32, i32
  }
  func.func @transform_2(%arg0: i32) -> (i32, i32) {
    %c0_i32 = arith.constant 0 : i32
    %c0_i32_0 = arith.constant 0 : i32
    %c0_i32_1 = arith.constant 0 : i32
    return %c0_i32, %c0_i32_0 : i32, i32
  }
  func.func @transform_3(%arg0: i32) -> (i32, i32, i32) {
    %c0_i32 = arith.constant 0 : i32
    %c0_i32_0 = arith.constant 0 : i32
    %c0_i32_1 = arith.constant 0 : i32
    %c0_i32_2 = arith.constant 0 : i32
    return %c0_i32, %c0_i32_0, %c0_i32_1 : i32, i32, i32
  }
  func.func @transform_4(%arg0: i32) -> (i32, i32) {
    %c0_i32 = arith.constant 0 : i32
    %c0_i32_0 = arith.constant 0 : i32
    %c0_i32_1 = arith.constant 0 : i32
    return %c0_i32, %c0_i32_0 : i32, i32
  }
  func.func @transform_5(%arg0: i32) -> (i32, i32, i32) {
    %c0_i32 = arith.constant 0 : i32
    %c0_i32_0 = arith.constant 0 : i32
    %c0_i32_1 = arith.constant 0 : i32
    %c0_i32_2 = arith.constant 0 : i32
    return %c0_i32, %c0_i32_0, %c0_i32_1 : i32, i32, i32
  }
  func.func @transform_6(%arg0: i32) -> (i32, i32) {
    %c0_i32 = arith.constant 0 : i32
    %c0_i32_0 = arith.constant 0 : i32
    %c0_i32_1 = arith.constant 0 : i32
    return %c0_i32, %c0_i32_0 : i32, i32
  }
  func.func @transform_7(%arg0: i32) -> (i32, i32, i32) {
    %c0_i32 = arith.constant 0 : i32
    %c0_i32_0 = arith.constant 0 : i32
    %c0_i32_1 = arith.constant 0 : i32
    %c0_i32_2 = arith.constant 0 : i32
    return %c0_i32, %c0_i32_0, %c0_i32_1 : i32, i32, i32
  }
  func.func @transform_8(%arg0: i32) -> (i32, i32) {
    %c0_i32 = arith.constant 0 : i32
    %c0_i32_0 = arith.constant 0 : i32
    %c0_i32_1 = arith.constant 0 : i32
    return %c0_i32, %c0_i32_0 : i32, i32
  }
  func.func @transform_9(%arg0: i32) -> (i32, i32, i32) {
    %c0_i32 = arith.constant 0 : i32
    %c0_i32_0 = arith.constant 0 : i32
    %c0_i32_1 = arith.constant 0 : i32
    return %arg0, %c0_i32, %c0_i32_0 : i32, i32, i32
  }
  func.func @transform_10(%arg0: i32) -> (i32, i32, i32) {
    %c0_i32 = arith.constant 0 : i32
    %c0_i32_0 = arith.constant 0 : i32
    %c0_i32_1 = arith.constant 0 : i32
    return %arg0, %c0_i32, %c0_i32_0 : i32, i32, i32
  }
  func.func @transform_11(%arg0: i32) -> (i32, i32, i32) {
    %c0_i32 = arith.constant 0 : i32
    %c0_i32_0 = arith.constant 0 : i32
    %c0_i32_1 = arith.constant 0 : i32
    return %arg0, %c0_i32, %c0_i32_0 : i32, i32, i32
  }
  func.func @transform_12(%arg0: i32) -> (i32, i32, i32) {
    %c0_i32 = arith.constant 0 : i32
    %c0_i32_0 = arith.constant 0 : i32
    %c0_i32_1 = arith.constant 0 : i32
    return %arg0, %c0_i32, %c0_i32_0 : i32, i32, i32
  }
}

</mosaic_0001>

<bundles_post_ra>
// kernel: msdiscriminator_forward.2
= control target key start
LH: loop header
LB: loop body
LE: loop exit
PB: predicated region body
PF: predicated region fallthrough
CT: control target
= control target key end

     0   :  { %s1930_s21 = smov 0   ;;  %s2256_s0 = inlined_call_operand.vmem [shape: f32[4,68,8], index: 0, kind: input, shape index: {}]   ;;  %s2257_s1 = inlined_call_operand.vmem [shape: f32[5,8,8], index: 1, kind: input, shape index: {}]   ;;  %s2258_s2 = inlined_call_operand.vmem [shape: f32[1,8], index: 2, kind: input, shape index: {}]   ;;  %s2259_s3 = inlined_call_operand.vmem [shape: f32[5,8,16], index: 3, kind: input, shape index: {}]   ;;  %s2260_s4 = inlined_call_operand.vmem [shape: f32[1,16], index: 4, kind: input, shape index: {}]   ;;  %s2261_s5 = inlined_call_operand.vmem [shape: f32[3,16,16], index: 5, kind: input, shape index: {}]   ;;  %s2262_s6 = inlined_call_operand.vmem [shape: f32[1,16], index: 6, kind: input, shape index: {}]   ;;  %s2263_s7 = inlined_call_operand.vmem [shape: f32[3,16,8], index: 7, kind: input, shape index: {}]   ;;  %s2264_s8 = inlined_call_operand.vmem [shape: f32[1,8], index: 8, kind: input, shape index: {}]   ;;  %s2265_s9 = inlined_call_operand.vmem [shape: f32[4,64,8], index: 9, kind: output, shape index: {0}]   ;;  %s2266_s10 = inlined_call_operand.vmem [shape: f32[4,32,16], index: 10, kind: output, shape index: {1}]   ;;  %s2267_s11 = inlined_call_operand.vmem [shape: f32[4,32,16], index: 11, kind: output, shape index: {2}]   ;;  %s2268_s12 = inlined_call_operand.vmem [shape: f32[4,36,8], index: 12, kind: output, shape index: {3}]  }
   0x1 LB: > { %s1718_s22 = sadd.s32 4294967295, %s1862_s21   ;;  %p1722_p0 = scmp.ge.s32.totalorder %s1862_s21, 1  ;;  %s1862_s21 = sphi %s1930_s21, %s23_s21  }
   0x2   : > { %p369_p1 = scmp.lt.s32.totalorder %s1862_s21, 5 }
   0x4   : > { %p370_p2 = pnand %p1722_p0, %p369_p1 }
   0x5   : > { %p426_p3 = scmp.lt.s32.totalorder (!%p370_p2), %s1718_s22, 3 }
   0x6   : > { %373 = sbr.rel (%p370_p2) target bundleno = 734 (0x2de), region = 56 }
   0xb   : > { %v1731_v0 = vld [vmem:[%s2257_s1 + $0x8] sm:$0xff]  ;;  %v1766_v1 = vld [vmem:[%s2257_s1 + $0x20] sm:$0xff]  ;;  %v1748_v2 = vld [vmem:[%s2257_s1 + $0x10] sm:$0xff]  ;;  %s2270_s22 = smov (!%p426_p3, %s1718_s22), 3  ;;  %vm470_vm0 = vcmask 64512   ;;  %vm894_vm1 = vcmask 58368  }
   0xc   : > { %510 = vmatpush.msra.mxu0 %v1731_v0  ;;  %1839 = vmatpush.msra.mxu1 %v1731_v0  ;;  %v1757_v3 = vld [vmem:[%s2257_s1 + $0x18] sm:$0xff]  ;;  %v459_v4 = vld [vmem:[%s2257_s1] sm:$0xff]  ;;  %s1841_s15 = smul.u32 72, %s2270_s22  ;;  %v1775_v46 = vld [vmem:[%s2259_s3 + $0x8] sm:$0xff]  ;;  %v1864_v59 = vmov 0.0   ;;  %s1836_s29 = sshll.u32 %s2270_s22, 6 }
   0xd   : > { %1840 = vmatpush.msra.mxu2 %v1731_v0  ;;  %733 = vmatpush.msra.mxu3 %v1757_v3  ;;  %v912_v45 = vld [vmem:[%s2259_s3] sm:$0xff]  ;;  %v1784_v58 = vld [vmem:[%s2259_s3 + $0x10] sm:$0xff]  ;;  %895 = vst.msk [vmem:[#allocation2] sm:$0x3] %vm894_vm1, %v1864_v59  ;;  %s2068_s14 = scalar_lea.vmem %s2265_s9, %s1836_s29  ;;  %vm1195_vm10 = vcmask 122880   ;;  %s1837_s17 = sshll.u32 %s2270_s22, 5 }
   0xe   : > { %816 = vmatpush.msrb.mxu0 %v1766_v1  ;;  %575 = vmatpush.msrb.mxu1 %v459_v4  ;;  %s1959_s18 = scalar_lea.vmem %s2256_s0, %s1841_s15  ;;  %896 = vst.msk [vmem:[#allocation2 + $0x42] sm:$0x3] %vm894_vm1, %v1864_v59  ;;  %s2159_s20 = scalar_lea.vmem %s2266_s10, %s1837_s17  ;;  %vm1190_vm12 = vcmask 130048   ;;  %vm1373_vm1 = vcmask 124928  }
   0xf   : > { %650 = vmatpush.msrb.mxu2 %v1748_v2  ;;  %v460_v5 = vld [vmem:[%s1959_s18 + $0x1] sm:$0xff]  ;;  %v465_v6 = vld [vmem:[%s1959_s18 + $0x29] sm:$0xff]  ;;  %v467_v7 = vld [vmem:[%s1959_s18 + $0x39] sm:$0xff]  ;;  %1042 = vmatpush.msrb.mxu3 %v1784_v58  ;;  %1196 = vst.msk [vmem:[#allocation3] sm:$0x1] %vm1195_vm10, %v1864_v59  ;;  %s2213_s24 = scalar_lea.vmem %s2267_s11, %s1837_s17  ;;  %s1842_s17 = smul.u32 40, %s2270_s22 }
  0x10   : > { %1732 = vmatmul.msk.f32.vlgmr.msra.gmra.mxu0 %vm470_vm0, %v460_v5  ;;  %1737 = vmatmul.msk.f32.vlgmr.msra.gmra.mxu1 %vm470_vm0, %v465_v6  ;;  %v684_v8 = vld [vmem:[%s1959_s18 + $0x3] sm:$0xff]  ;;  %v466_v10 = vld [vmem:[%s1959_s18 + $0x31] sm:$0xff]  ;;  %v463_v17 = vld [vmem:[%s1959_s18 + $0x19] sm:$0xff]  ;;  %1197 = vst.msk [vmem:[#allocation3 + $0x21] sm:$0x1] %vm1195_vm10, %v1864_v59 }
  0x11   : > { %1739 = vmatmul.msk.f32.vlgmr.msra.gmra.mxu2 %vm470_vm0, %v467_v7  ;;  %1758 = vmatmul.msk.f32.vlgmr.msra.gmra.mxu3 %vm470_vm0, %v684_v8  ;;  %v461_v9 = vld [vmem:[%s1959_s18 + $0x9] sm:$0xff]  ;;  %v462_v13 = vld [vmem:[%s1959_s18 + $0x11] sm:$0xff]  ;;  %v451_v14 = vld [vmem:[%s1959_s18] sm:$0xff]  ;;  %1374 = vst.msk [vmem:[#allocation4] sm:$0x7] %vm1373_vm1, %v1864_v59  ;;  %s450_s29 = scalar_lea.vmem %s2268_s12, %s1842_s17 }
  0x12   : > { %v601_v11 = vld [vmem:[%s1959_s18 + $0x2] sm:$0xff]  ;;  %v685_v12 = vld [vmem:[%s1959_s18 + $0xb] sm:$0xff]  ;;  %v686_v16 = vld [vmem:[%s1959_s18 + $0x13] sm:$0xff]  ;;  %991 = vmatpush.msra.mxu2 %v912_v45  ;;  %950 = vmatpush.msra.mxu1 %v1775_v46  ;;  %1375 = vst.msk [vmem:[#allocation4 + $0x23] sm:$0x7] %vm1373_vm1, %v1864_v59 }
  0x13   : > { %v602_v15 = vld [vmem:[%s1959_s18 + $0xa] sm:$0xff]  ;;  %v603_v19 = vld [vmem:[%s1959_s18 + $0x12] sm:$0xff]  ;;  %v687_v20 = vld [vmem:[%s1959_s18 + $0x1b] sm:$0xff] }
  0x14   : > { %v452_v18 = vld [vmem:[%s1959_s18 + $0x8] sm:$0xff]  ;;  %v453_v22 = vld [vmem:[%s1959_s18 + $0x10] sm:$0xff]  ;;  %v604_v23 = vld [vmem:[%s1959_s18 + $0x1a] sm:$0xff] }
  0x15   : > { %v464_v21 = vld [vmem:[%s1959_s18 + $0x21] sm:$0xff]  ;;  %v454_v25 = vld [vmem:[%s1959_s18 + $0x18] sm:$0xff]  ;;  %v689_v28 = vld [vmem:[%s1959_s18 + $0x2b] sm:$0xff] }
  0x16   : > { %v688_v24 = vld [vmem:[%s1959_s18 + $0x23] sm:$0xff]  ;;  %v768_v30 = vld [vmem:[%s1959_s18 + $0xc] sm:$0xff]  ;;  %v769_v34 = vld [vmem:[%s1959_s18 + $0x14] sm:$0xff] }
  0x17   : > { %v767_v26 = vld [vmem:[%s1959_s18 + $0x4] sm:$0xff]  ;;  %v690_v32 = vld [vmem:[%s1959_s18 + $0x33] sm:$0xff]  ;;  %v691_v36 = vld [vmem:[%s1959_s18 + $0x3b] sm:$0xff] }
  0x18   : > { %1733 = vmatmul.msk.f32.gmra.mxu0 %vm470_vm0, %v461_v9  ;;  %1738 = vmatmul.msk.f32.gmra.mxu1 %vm470_vm0, %v466_v10  ;;  %v605_v27 = vld [vmem:[%s1959_s18 + $0x22] sm:$0xff]  ;;  %v606_v31 = vld [vmem:[%s1959_s18 + $0x2a] sm:$0xff]  ;;  %v607_v35 = vld [vmem:[%s1959_s18 + $0x32] sm:$0xff] }
  0x19   : > { %1749 = vmatmul.msk.f32.vlgmr.msrb.gmra.mxu2 %vm470_vm0, %v601_v11  ;;  %1759 = vmatmul.msk.f32.gmra.mxu3 %vm470_vm0, %v685_v12  ;;  %v455_v29 = vld [vmem:[%s1959_s18 + $0x20] sm:$0xff]  ;;  %v456_v33 = vld [vmem:[%s1959_s18 + $0x28] sm:$0xff]  ;;  %v457_v37 = vld [vmem:[%s1959_s18 + $0x30] sm:$0xff] }
  0x1a   : > { %v770_v38 = vld [vmem:[%s1959_s18 + $0x1c] sm:$0xff]  ;;  %v771_v41 = vld [vmem:[%s1959_s18 + $0x24] sm:$0xff]  ;;  %v772_v42 = vld [vmem:[%s1959_s18 + $0x2c] sm:$0xff] }
  0x1b   : > { %v608_v39 = vld [vmem:[%s1959_s18 + $0x3a] sm:$0xff] }
  0x1c   : > { %v458_v40 = vld [vmem:[%s1959_s18 + $0x38] sm:$0xff]  ;;  %v2061_v5 = vld [vmem:[%s2258_s2] ss:$0 sm:$0xff] }
  0x1d   : > { %v773_v43 = vld [vmem:[%s1959_s18 + $0x34] sm:$0xff]  ;;  %v774_v44 = vld [vmem:[%s1959_s18 + $0x3c] sm:$0xff] }
  0x20   : > { %1734 = vmatmul.msk.f32.gmra.mxu0 %vm470_vm0, %v462_v13  ;;  %1740 = vmatmul.msk.f32.vlgmr.msrb.gmra.mxu1 %vm470_vm0, %v451_v14 }
  0x21   : > { %1750 = vmatmul.msk.f32.gmra.mxu2 %vm470_vm0, %v602_v15  ;;  %1760 = vmatmul.msk.f32.gmra.mxu3 %vm470_vm0, %v686_v16 }
  0x28   : > { %1735 = vmatmul.msk.f32.gmra.mxu0 %vm470_vm0, %v463_v17  ;;  %1741 = vmatmul.msk.f32.gmra.mxu1 %vm470_vm0, %v452_v18 }
  0x29   : > { %1751 = vmatmul.msk.f32.gmra.mxu2 %vm470_vm0, %v603_v19  ;;  %1761 = vmatmul.msk.f32.gmra.mxu3 %vm470_vm0, %v687_v20 }
  0x30   : > { %1736 = vmatmul.msk.f32.gmra.mxu0 %vm470_vm0, %v464_v21  ;;  %1742 = vmatmul.msk.f32.gmra.mxu1 %vm470_vm0, %v453_v22 }
  0x31   : > { %1752 = vmatmul.msk.f32.gmra.mxu2 %vm470_vm0, %v604_v23  ;;  %1762 = vmatmul.msk.f32.gmra.mxu3 %vm470_vm0, %v688_v24 }
  0x38   : > { %1743 = vmatmul.msk.f32.gmra.mxu1 %vm470_vm0, %v454_v25  ;;  %1767 = vmatmul.msk.f32.vlgmr.msrb.gmra.mxu0 %vm470_vm0, %v767_v26 }
  0x39   : > { %1753 = vmatmul.msk.f32.gmra.mxu2 %vm470_vm0, %v605_v27  ;;  %1763 = vmatmul.msk.f32.gmra.mxu3 %vm470_vm0, %v689_v28 }
  0x40   : > { %1744 = vmatmul.msk.f32.gmra.mxu1 %vm470_vm0, %v455_v29  ;;  %1768 = vmatmul.msk.f32.gmra.mxu0 %vm470_vm0, %v768_v30 }
  0x41   : > { %1754 = vmatmul.msk.f32.gmra.mxu2 %vm470_vm0, %v606_v31  ;;  %1764 = vmatmul.msk.f32.gmra.mxu3 %vm470_vm0, %v690_v32 }
  0x48   : > { %1745 = vmatmul.msk.f32.gmra.mxu1 %vm470_vm0, %v456_v33  ;;  %1769 = vmatmul.msk.f32.gmra.mxu0 %vm470_vm0, %v769_v34 }
  0x49   : > { %1755 = vmatmul.msk.f32.gmra.mxu2 %vm470_vm0, %v607_v35  ;;  %1765 = vmatmul.msk.f32.gmra.mxu3 %vm470_vm0, %v691_v36 }
  0x50   : > { %1746 = vmatmul.msk.f32.gmra.mxu1 %vm470_vm0, %v457_v37  ;;  %1770 = vmatmul.msk.f32.gmra.mxu0 %vm470_vm0, %v770_v38 }
  0x51   : > { %1756 = vmatmul.msk.f32.gmra.mxu2 %vm470_vm0, %v608_v39 }
  0x58   : > { %1747 = vmatmul.msk.f32.gmra.mxu1 %vm470_vm0, %v458_v40  ;;  %1771 = vmatmul.msk.f32.gmra.mxu0 %vm470_vm0, %v771_v41 }
  0x60   : > { %1772 = vmatmul.msk.f32.gmra.mxu0 %vm470_vm0, %v772_v42 }
  0x68   : > { %1773 = vmatmul.msk.f32.gmra.mxu0 %vm470_vm0, %v773_v43  ;;  %v1794_v43 = vld [vmem:[%s2259_s3 + $0x20] sm:$0xff] }
  0x69   : > { %1152 = vmatpush.msrb.mxu2 %v1794_v43  ;;  %v1206_v43 = vld [vmem:[%s2261_s5] sm:$0xff] }
  0x70   : > { %1774 = vmatmul.msk.f32.gmra.mxu0 %vm470_vm0, %v774_v44  ;;  %v1789_v44 = vld [vmem:[%s2259_s3 + $0x18] sm:$0xff] }
  0x71   : > { %1097 = vmatpush.msrb.mxu1 %v1789_v44 }
  0x8d   : > { %v512_v47 = vpop.f32.mrf.mxu0  ;;  %v2047_v48 = vpop.f32.mrf.mxu1 }
  0x94   : > { %v2049_v49 = vpop.f32.mrf.mxu2  ;;  %v735_v55 = vpop.f32.mrf.mxu3 }
  0x95   : > { %v515_v50 = vpop.f32.mrf.mxu0  ;;  %v2051_v51 = vpop.f32.mrf.mxu1 }
  0x9c   : > { %v652_v54 = vpop.f32.mrf.mxu2  ;;  %v738_v62 = vpop.f32.mrf.mxu3 }
  0x9d   : > { %v518_v52 = vpop.f32.mrf.mxu0  ;;  %v577_v53 = vpop.f32.mrf.mxu1 }
  0x9e   : > { %v578_v61 = vadd.f32 %v577_v53, %v512_v47 }
  0xa0   : > { %v676_v1 = vadd.f32 %v652_v54, %v578_v61 }
  0xa2   : > { %v759_v3 = vadd.f32 %v735_v55, %v676_v1 }
  0xa4   : > { %v655_v60 = vpop.f32.mrf.mxu2  ;;  %v741_v8 = vpop.f32.mrf.mxu3 }
  0xa5   : > { %v521_v56 = vpop.f32.mrf.mxu0  ;;  %v580_v57 = vpop.f32.mrf.mxu1 }
  0xa6   : > { %v581_v4 = vadd.f32 %v580_v57, %v515_v50 }
  0xa8   : > { %v677_v9 = vadd.f32 %v655_v60, %v581_v4 }
  0xaa   : > { %v760_v13 = vadd.f32 %v738_v62, %v677_v9 }
  0xac   : > { %v658_v2 = vpop.f32.mrf.mxu2  ;;  %v744_v21 = vpop.f32.mrf.mxu3 }
  0xad   : > { %v524_v63 = vpop.f32.mrf.mxu0  ;;  %v583_v0 = vpop.f32.mrf.mxu1 }
  0xae   : > { %v584_v14 = vadd.f32 %v583_v0, %v518_v52 }
  0xb0   : > { %v678_v19 = vadd.f32 %v658_v2, %v584_v14 }
  0xb2   : > { %v761_v24 = vadd.f32 %v741_v8, %v678_v19 }
  0xb4   : > { %v661_v16 = vpop.f32.mrf.mxu2  ;;  %v747_v33 = vpop.f32.mrf.mxu3 }
  0xb5   : > { %v818_v6 = vpop.f32.mrf.mxu0  ;;  %v586_v11 = vpop.f32.mrf.mxu1 }
  0xb6   : > { %v842_v7 = vadd.f32 %v818_v6, %v759_v3  ;;  %v587_v25 = vadd.f32 %v586_v11, %v521_v56 }
  0xb8   : > { %v854_v10 = vadd.f32 %v2061_v5, %v842_v7  ;;  %v679_v30 = vadd.f32 %v661_v16, %v587_v25 }
  0xba   : > { %vm862_vm2 = vcmp.ge.f32.partialorder %v854_v10, 0.0  ;;  %v870_v12 = vmul.f32 0.1, %v854_v10  ;;  %v762_v34 = vadd.f32 %v744_v21, %v679_v30 }
  0xbc   : > { %v878_v15 = vsel %vm862_vm2, %v854_v10, %v870_v12  ;;  %v664_v29 = vpop.f32.mrf.mxu2  ;;  %v750_v55 = vpop.f32.mrf.mxu3 }
  0xbd   : > { %886 = vst.msk [vmem:[%s2068_s14] sm:$0xff] %vm470_vm0, %v878_v15  ;;  %v821_v17 = vpop.f32.mrf.mxu0  ;;  %v589_v23 = vpop.f32.mrf.mxu1 }
  0xbe   : > { %897 = vst.msk [vmem:[#allocation2 + $0x2] sm:$0xff] %vm470_vm0, %v878_v15  ;;  %v843_v18 = vadd.f32 %v821_v17, %v760_v13  ;;  %v590_v35 = vadd.f32 %v589_v23, %v524_v63 }
  0xc0   : > { %v855_v20 = vadd.f32 %v2061_v5, %v843_v18  ;;  %v680_v45 = vadd.f32 %v664_v29, %v590_v35 }
  0xc2   : > { %vm863_vm3 = vcmp.ge.f32.partialorder %v855_v20, 0.0  ;;  %v871_v22 = vmul.f32 0.1, %v855_v20  ;;  %v763_v52 = vadd.f32 %v747_v33, %v680_v45  ;;  %v1810_v45 = vld [vmem:[%s2261_s5 + $0x28] sm:$0xff] }
  0xc4   : > { %v879_v26 = vsel %vm863_vm3, %v855_v20, %v871_v22  ;;  %v667_v47 = vpop.f32.mrf.mxu2  ;;  %v753_v8 = vpop.f32.mrf.mxu3 }
  0xc5   : > { %887 = vst.msk [vmem:[%s2068_s14 + $0x8] sm:$0xff] %vm470_vm0, %v879_v26  ;;  %v824_v27 = vpop.f32.mrf.mxu0  ;;  %v592_v37 = vpop.f32.mrf.mxu1 }
  0xc6   : > { %898 = vst.msk [vmem:[#allocation2 + $0xa] sm:$0xff] %vm470_vm0, %v879_v26  ;;  %v844_v28 = vadd.f32 %v824_v27, %v761_v24  ;;  %v593_v53 = vadd.f32 %v592_v37, %v2047_v48 }
  0xc8   : > { %v856_v31 = vadd.f32 %v2061_v5, %v844_v28  ;;  %v681_v60 = vadd.f32 %v667_v47, %v593_v53 }
  0xca   : > { %vm864_vm4 = vcmp.ge.f32.partialorder %v856_v31, 0.0  ;;  %v872_v32 = vmul.f32 0.1, %v856_v31  ;;  %v764_v0 = vadd.f32 %v750_v55, %v681_v60  ;;  %v1809_v55 = vld [vmem:[%s2261_s5 + $0x20] sm:$0xff] }
  0xcc   : > { %v880_v36 = vsel %vm864_vm4, %v856_v31, %v872_v32  ;;  %v670_v63 = vpop.f32.mrf.mxu2  ;;  %v756_v20 = vpop.f32.mrf.mxu3 }
  0xcd   : > { %888 = vst.msk [vmem:[%s2068_s14 + $0x10] sm:$0xff] %vm470_vm0, %v880_v36  ;;  %v827_v38 = vpop.f32.mrf.mxu0  ;;  %v914_v39 = vld [vmem:[#allocation2 + $0x1] ss:$2 sm:$0xff]  ;;  %v905_v40 = vld [vmem:[#allocation2] ss:$2 sm:$0xff]  ;;  %v595_v58 = vpop.f32.mrf.mxu1 }
  0xce   : > { %899 = vst.msk [vmem:[#allocation2 + $0x12] sm:$0xff] %vm470_vm0, %v880_v36  ;;  %v845_v41 = vadd.f32 %v827_v38, %v762_v34  ;;  %1776 = vmatmul.msk.f32.vlgmr.msra.gmra.mxu1 %vm470_vm0, %v914_v39  ;;  %1780 = vmatmul.msk.f32.vlgmr.msra.gmra.mxu2 %vm470_vm0, %v905_v40  ;;  %v1006_v42 = vld [vmem:[#allocation2 + $0x2] ss:$2 sm:$0xff]  ;;  %v596_v1 = vadd.f32 %v595_v58, %v2051_v51  ;;  %v1061_v34 = vld [vmem:[#allocation2 + $0x3] ss:$2 sm:$0xff] }
  0xcf   : > { %1785 = vmatmul.msk.f32.vlgmr.msrb.gmra.mxu3 %vm470_vm0, %v1006_v42  ;;  %v1800_v42 = vld [vmem:[%s2261_s5 + $0x18] sm:$0xff]  ;;  %1330 = vmatpush.msra.mxu1 %v1810_v45 }
  0xd0   : > { %v857_v46 = vadd.f32 %v2061_v5, %v845_v41  ;;  %v682_v9 = vadd.f32 %v670_v63, %v596_v1  ;;  %v1207_v41 = vld [vmem:[%s2261_s5 + $0x8] sm:$0xff]  ;;  %1241 = vmatpush.msra.mxu3 %v1800_v42 }
  0xd1   : > { %1282 = vmatpush.msra.mxu0 %v1207_v41  ;;  %1331 = vmatpush.msra.mxu1 %v1809_v55 }
  0xd2   : > { %vm865_vm5 = vcmp.ge.f32.partialorder %v857_v46, 0.0  ;;  %v873_v50 = vmul.f32 0.1, %v857_v46  ;;  %v765_v12 = vadd.f32 %v753_v8, %v682_v9 }
  0xd3   : > { %1283 = vmatpush.msra.mxu0 %v1206_v43 }
  0xd4   : > { %v881_v54 = vsel %vm865_vm5, %v857_v46, %v873_v50  ;;  %v673_v15 = vpop.f32.mrf.mxu2 }
  0xd5   : > { %889 = vst.msk [vmem:[%s2068_s14 + $0x18] sm:$0xff] %vm470_vm0, %v881_v54  ;;  %v830_v56 = vpop.f32.mrf.mxu0  ;;  %v598_v10 = vpop.f32.mrf.mxu1  ;;  %v1116_v35 = vld [vmem:[#allocation2 + $0x4] ss:$2 sm:$0xff] }
  0xd6   : > { %900 = vst.msk [vmem:[#allocation2 + $0x1a] sm:$0xff] %vm470_vm0, %v881_v54  ;;  %v846_v57 = vadd.f32 %v830_v56, %v763_v52  ;;  %v599_v13 = vadd.f32 %v598_v10, %v2049_v49  ;;  %v1799_v52 = vld [vmem:[%s2261_s5 + $0x10] sm:$0xff] }
  0xd7   : > { %1242 = vmatpush.msra.mxu3 %v1799_v52  ;;  %v1385_v52 = vld [vmem:[%s2263_s7] sm:$0xff] }
  0xd8   : > { %v858_v61 = vadd.f32 %v2061_v5, %v846_v57  ;;  %v683_v18 = vadd.f32 %v673_v15, %v599_v13 }
  0xda   : > { %vm866_vm6 = vcmp.ge.f32.partialorder %v858_v61, 0.0  ;;  %v874_v62 = vmul.f32 0.1, %v858_v61  ;;  %v766_v22 = vadd.f32 %v756_v20, %v683_v18 }
  0xdc   : > { %v882_v48 = vsel %vm866_vm6, %v858_v61, %v874_v62  ;;  %vm1562_vm6 = vcmask 60416  }
  0xdd   : > { %890 = vst.msk [vmem:[%s2068_s14 + $0x20] sm:$0xff] %vm470_vm0, %v882_v48  ;;  %v833_v2 = vpop.f32.mrf.mxu0  ;;  %v916_v3 = vld [vmem:[#allocation2 + $0x11] ss:$2 sm:$0xff]  ;;  %v907_v4 = vld [vmem:[#allocation2 + $0x10] ss:$2 sm:$0xff] }
  0xde   : > { %901 = vst.msk [vmem:[#allocation2 + $0x22] sm:$0xff] %vm470_vm0, %v882_v48  ;;  %v847_v6 = vadd.f32 %v833_v2, %v764_v0  ;;  %1777 = vmatmul.msk.f32.gmra.mxu1 %vm470_vm0, %v916_v3  ;;  %1781 = vmatmul.msk.f32.gmra.mxu2 %vm470_vm0, %v907_v4  ;;  %v1008_v7 = vld [vmem:[#allocation2 + $0x12] ss:$2 sm:$0xff] }
  0xdf   : > { %1786 = vmatmul.msk.f32.gmra.mxu3 %vm470_vm0, %v1008_v7  ;;  %v1853_v0 = vld [vmem:[%s2260_s4] ss:$0 sm:$0xff] }
  0xe0   : > { %v859_v51 = vadd.f32 %v2061_v5, %v847_v6 }
  0xe2   : > { %vm867_vm7 = vcmp.ge.f32.partialorder %v859_v51, 0.0  ;;  %v875_v11 = vmul.f32 0.1, %v859_v51 }
  0xe4   : > { %v883_v14 = vsel %vm867_vm7, %v859_v51, %v875_v11 }
  0xe5   : > { %891 = vst.msk [vmem:[%s2068_s14 + $0x28] sm:$0xff] %vm470_vm0, %v883_v14  ;;  %v836_v16 = vpop.f32.mrf.mxu0  ;;  %v1118_v36 = vld [vmem:[#allocation2 + $0x14] ss:$2 sm:$0xff] }
  0xe6   : > { %902 = vst.msk [vmem:[#allocation2 + $0x2a] sm:$0xff] %vm470_vm0, %v883_v14  ;;  %v848_v17 = vadd.f32 %v836_v16, %v765_v12 }
  0xe8   : > { %v860_v19 = vadd.f32 %v2061_v5, %v848_v17 }
  0xea   : > { %vm868_vm8 = vcmp.ge.f32.partialorder %v860_v19, 0.0  ;;  %v876_v21 = vmul.f32 0.1, %v860_v19 }
  0xec   : > { %v884_v23 = vsel %vm868_vm8, %v860_v19, %v876_v21 }
  0xed   : > { %892 = vst.msk [vmem:[%s2068_s14 + $0x30] sm:$0xff] %vm470_vm0, %v884_v23  ;;  %v839_v49 = vpop.f32.mrf.mxu0  ;;  %v918_v24 = vld [vmem:[#allocation2 + $0x21] ss:$2 sm:$0xff]  ;;  %v909_v25 = vld [vmem:[#allocation2 + $0x20] ss:$2 sm:$0xff] }
  0xee   : > { %903 = vst.msk [vmem:[#allocation2 + $0x32] sm:$0xff] %vm470_vm0, %v884_v23  ;;  %v849_v26 = vadd.f32 %v839_v49, %v766_v22  ;;  %1778 = vmatmul.msk.f32.gmra.mxu1 %vm470_vm0, %v918_v24  ;;  %1782 = vmatmul.msk.f32.gmra.mxu2 %vm470_vm0, %v909_v25  ;;  %v1010_v27 = vld [vmem:[#allocation2 + $0x22] ss:$2 sm:$0xff]  ;;  %v1065_v37 = vld [vmem:[#allocation2 + $0x23] ss:$2 sm:$0xff]  ;;  %v1816_v24 = vld [vmem:[%s2263_s7 + $0x18] sm:$0xff] }
  0xef   : > { %1787 = vmatmul.msk.f32.gmra.mxu3 %vm470_vm0, %v1010_v27  ;;  %v1386_v25 = vld [vmem:[%s2263_s7 + $0x8] sm:$0xff]  ;;  %1424 = vmatpush.msra.mxu2 %v1816_v24 }
  0xf0   : > { %v861_v28 = vadd.f32 %v2061_v5, %v849_v26  ;;  %v1063_v5 = vld [vmem:[#allocation2 + $0x13] ss:$2 sm:$0xff]  ;;  %1471 = vmatpush.msrb.mxu3 %v1386_v25 }
  0xf2   : > { %vm869_vm9 = vcmp.ge.f32.partialorder %v861_v28, 0.0  ;;  %v877_v29 = vmul.f32 0.1, %v861_v28  ;;  %1472 = vmatpush.msrb.mxu3 %v1385_v52 }
  0xf4   : > { %v885_v30 = vsel %vm869_vm9, %v861_v28, %v877_v29 }
  0xf5   : > { %893 = vst.msk [vmem:[%s2068_s14 + $0x38] sm:$0xff] %vm470_vm0, %v885_v30  ;;  %v1120_v38 = vld [vmem:[#allocation2 + $0x24] ss:$2 sm:$0xff] }
  0xf6   : > { %904 = vst.msk [vmem:[#allocation2 + $0x3a] sm:$0xff] %vm470_vm0, %v885_v30 }
  0xfd   : > { %v920_v31 = vld [vmem:[#allocation2 + $0x31] ss:$2 sm:$0xff]  ;;  %v911_v32 = vld [vmem:[#allocation2 + $0x30] ss:$2 sm:$0xff] }
  0xfe   : > { %v1012_v33 = vld [vmem:[#allocation2 + $0x32] ss:$2 sm:$0xff]  ;;  %1779 = vmatmul.msk.f32.gmra.mxu1 %vm470_vm0, %v920_v31  ;;  %1783 = vmatmul.msk.f32.gmra.mxu2 %vm470_vm0, %v911_v32  ;;  %v1067_v39 = vld [vmem:[#allocation2 + $0x33] ss:$2 sm:$0xff] }
  0xff   : > { %1788 = vmatmul.msk.f32.gmra.mxu3 %vm470_vm0, %v1012_v33  ;;  %v1122_v40 = vld [vmem:[#allocation2 + $0x34] ss:$2 sm:$0xff] }
 0x106   : > { %1790 = vmatmul.msk.f32.vlgmr.msrb.gmra.mxu1 %vm470_vm0, %v1061_v34  ;;  %1795 = vmatmul.msk.f32.vlgmr.msrb.gmra.mxu2 %vm470_vm0, %v1116_v35 }
 0x10e   : > { %1791 = vmatmul.msk.f32.gmra.mxu1 %vm470_vm0, %v1063_v5  ;;  %1796 = vmatmul.msk.f32.gmra.mxu2 %vm470_vm0, %v1118_v36 }
 0x116   : > { %1792 = vmatmul.msk.f32.gmra.mxu1 %vm470_vm0, %v1065_v37  ;;  %1797 = vmatmul.msk.f32.gmra.mxu2 %vm470_vm0, %v1120_v38 }
 0x11e   : > { %1793 = vmatmul.msk.f32.gmra.mxu1 %vm470_vm0, %v1067_v39  ;;  %1798 = vmatmul.msk.f32.gmra.mxu2 %vm470_vm0, %v1122_v40 }
 0x14b   : > { %v952_v44 = vpop.f32.mrf.mxu1 }
 0x151   : > { %v993_v46 = vpop.f32.mrf.mxu2 }
 0x152   : > { %v994_v58 = vadd.f32 %v993_v46, %v952_v44  ;;  %v1044_v61 = vpop.f32.mrf.mxu3 }
 0x154   : > { %v1056_v62 = vadd.f32 %v1044_v61, %v994_v58 }
 0x15b   : > { %v955_v47 = vpop.f32.mrf.mxu1 }
 0x161   : > { %v996_v50 = vpop.f32.mrf.mxu2 }
 0x162   : > { %v997_v48 = vadd.f32 %v996_v50, %v955_v47  ;;  %v1047_v6 = vpop.f32.mrf.mxu3  ;;  %v1828_v47 = vld [vmem:[%s2263_s7 + $0x28] sm:$0xff]  ;;  %v1815_v50 = vld [vmem:[%s2263_s7 + $0x10] sm:$0xff] }
 0x163   : > { %1526 = vmatpush.msrb.mxu0 %v1828_v47  ;;  %1425 = vmatpush.msra.mxu2 %v1815_v50 }
 0x164   : > { %v1057_v7 = vadd.f32 %v1047_v6, %v997_v48 }
 0x16b   : > { %v958_v53 = vpop.f32.mrf.mxu1 }
 0x171   : > { %v999_v54 = vpop.f32.mrf.mxu2 }
 0x172   : > { %v1000_v11 = vadd.f32 %v999_v54, %v958_v53  ;;  %v1050_v15 = vpop.f32.mrf.mxu3  ;;  %v1827_v53 = vld [vmem:[%s2263_s7 + $0x20] sm:$0xff] }
 0x173   : > { %1527 = vmatpush.msrb.mxu0 %v1827_v53 }
 0x174   : > { %v1058_v16 = vadd.f32 %v1050_v15, %v1000_v11 }
 0x17b   : > { %v961_v56 = vpop.f32.mrf.mxu1 }
 0x181   : > { %v1002_v57 = vpop.f32.mrf.mxu2 }
 0x182   : > { %v1003_v23 = vadd.f32 %v1002_v57, %v961_v56  ;;  %v1053_v27 = vpop.f32.mrf.mxu3  ;;  %v1854_v57 = vld [vmem:[%s2262_s6] ss:$0 sm:$0xff] }
 0x183   : > { %v1099_v60 = vpop.f32.mrf.mxu1 }
 0x184   : > { %v1111_v63 = vadd.f32 %v1099_v60, %v1056_v62  ;;  %v1059_v29 = vadd.f32 %v1053_v27, %v1003_v23 }
 0x189   : > { %v1154_v1 = vpop.f32.mrf.mxu2 }
 0x18a   : > { %v1166_v2 = vadd.f32 %v1154_v1, %v1111_v63 }
 0x18b   : > { %v1102_v3 = vpop.f32.mrf.mxu1 }
 0x18c   : > { %v1174_v4 = vadd.f32 %v1853_v0, %v1166_v2  ;;  %v1112_v51 = vadd.f32 %v1102_v3, %v1057_v7 }
 0x18e   : > { %vm1178_vm11 = vcmp.ge.f32.partialorder %v1174_v4, 0.0  ;;  %v1182_v8 = vmul.f32 0.1, %v1174_v4 }
 0x190   : > { %v1186_v9 = vsel %vm1178_vm11, %v1174_v4, %v1182_v8 }
 0x191   : > { %1191 = vst.msk [vmem:[%s2159_s20] sm:$0xff] %vm1190_vm12, %v1186_v9  ;;  %v1157_v10 = vpop.f32.mrf.mxu2 }
 0x192   : > { %1198 = vst.msk [vmem:[#allocation3 + $0x1] sm:$0xff] %vm1190_vm12, %v1186_v9  ;;  %v1167_v12 = vadd.f32 %v1157_v10, %v1112_v51 }
 0x193   : > { %v1105_v13 = vpop.f32.mrf.mxu1 }
 0x194   : > { %v1175_v14 = vadd.f32 %v1853_v0, %v1167_v12  ;;  %v1113_v19 = vadd.f32 %v1105_v13, %v1058_v16 }
 0x196   : > { %vm1179_vm13 = vcmp.ge.f32.partialorder %v1175_v14, 0.0  ;;  %v1183_v17 = vmul.f32 0.1, %v1175_v14 }
 0x198   : > { %v1187_v18 = vsel %vm1179_vm13, %v1175_v14, %v1183_v17 }
 0x199   : > { %1192 = vst.msk [vmem:[%s2159_s20 + $0x8] sm:$0xff] %vm1190_vm12, %v1187_v18  ;;  %v1160_v20 = vpop.f32.mrf.mxu2  ;;  %v1208_v21 = vld [vmem:[#allocation3 + $0x1] sm:$0xff] }
 0x19a   : > { %v1202_v22 = vld [vmem:[#allocation3] sm:$0xff]  ;;  %1199 = vst.msk [vmem:[#allocation3 + $0x9] sm:$0xff] %vm1190_vm12, %v1187_v18  ;;  %v1168_v49 = vadd.f32 %v1160_v20, %v1113_v19  ;;  %1801 = vmatmul.msk.f32.vlgmr.msra.gmra.mxu3 %vm1190_vm12, %v1208_v21 }
 0x19b   : > { %1805 = vmatmul.msk.f32.vlgmr.msra.gmra.mxu0 %vm1190_vm12, %v1202_v22  ;;  %v1108_v28 = vpop.f32.mrf.mxu1 }
 0x19c   : > { %v1176_v26 = vadd.f32 %v1853_v0, %v1168_v49  ;;  %v1114_v32 = vadd.f32 %v1108_v28, %v1059_v29 }
 0x19e   : > { %vm1180_vm14 = vcmp.ge.f32.partialorder %v1176_v26, 0.0  ;;  %v1184_v30 = vmul.f32 0.1, %v1176_v26 }
 0x1a0   : > { %v1188_v31 = vsel %vm1180_vm14, %v1176_v26, %v1184_v30 }
 0x1a1   : > { %1193 = vst.msk [vmem:[%s2159_s20 + $0x10] sm:$0xff] %vm1190_vm12, %v1188_v31  ;;  %v1163_v33 = vpop.f32.mrf.mxu2  ;;  %v1209_v34 = vld [vmem:[#allocation3 + $0x9] sm:$0xff] }
 0x1a2   : > { %v1203_v35 = vld [vmem:[#allocation3 + $0x8] sm:$0xff]  ;;  %1200 = vst.msk [vmem:[#allocation3 + $0x11] sm:$0xff] %vm1190_vm12, %v1188_v31  ;;  %v1169_v36 = vadd.f32 %v1163_v33, %v1114_v32  ;;  %1802 = vmatmul.msk.f32.gmra.mxu3 %vm1190_vm12, %v1209_v34 }
 0x1a3   : > { %v1297_v5 = vld [vmem:[#allocation3 + $0x2] sm:$0xff]  ;;  %1806 = vmatmul.msk.f32.gmra.mxu0 %vm1190_vm12, %v1203_v35 }
 0x1a4   : > { %1811 = vmatmul.msk.f32.vlgmr.msra.gmra.mxu1 %vm1190_vm12, %v1297_v5  ;;  %v1177_v37 = vadd.f32 %v1853_v0, %v1169_v36 }
 0x1a6   : > { %vm1181_vm15 = vcmp.ge.f32.partialorder %v1177_v37, 0.0  ;;  %v1185_v38 = vmul.f32 0.1, %v1177_v37 }
 0x1a8   : > { %v1189_v39 = vsel %vm1181_vm15, %v1177_v37, %v1185_v38 }
 0x1a9   : > { %1194 = vst.msk [vmem:[%s2159_s20 + $0x18] sm:$0xff] %vm1190_vm12, %v1189_v39  ;;  %v1210_v40 = vld [vmem:[#allocation3 + $0x11] sm:$0xff] }
 0x1aa   : > { %v1204_v41 = vld [vmem:[#allocation3 + $0x10] sm:$0xff]  ;;  %1201 = vst.msk [vmem:[#allocation3 + $0x19] sm:$0xff] %vm1190_vm12, %v1189_v39  ;;  %1803 = vmatmul.msk.f32.gmra.mxu3 %vm1190_vm12, %v1210_v40  ;;  %v1855_v39 = vld [vmem:[%s2264_s8] ss:$0 sm:$0xff] }
 0x1ab   : > { %v1298_v42 = vld [vmem:[#allocation3 + $0xa] sm:$0xff]  ;;  %1807 = vmatmul.msk.f32.gmra.mxu0 %vm1190_vm12, %v1204_v41 }
 0x1ac   : > { %1812 = vmatmul.msk.f32.gmra.mxu1 %vm1190_vm12, %v1298_v42 }
 0x1b1   : > { %v1211_v43 = vld [vmem:[#allocation3 + $0x19] sm:$0xff] }
 0x1b2   : > { %v1205_v44 = vld [vmem:[#allocation3 + $0x18] sm:$0xff]  ;;  %1804 = vmatmul.msk.f32.gmra.mxu3 %vm1190_vm12, %v1211_v43 }
 0x1b3   : > { %v1299_v45 = vld [vmem:[#allocation3 + $0x12] sm:$0xff]  ;;  %1808 = vmatmul.msk.f32.gmra.mxu0 %vm1190_vm12, %v1205_v44  ;;  %v1300_v46 = vld [vmem:[#allocation3 + $0x1a] sm:$0xff] }
 0x1b4   : > { %1813 = vmatmul.msk.f32.gmra.mxu1 %vm1190_vm12, %v1299_v45 }
 0x1bc   : > { %1814 = vmatmul.msk.f32.gmra.mxu1 %vm1190_vm12, %v1300_v46 }
 0x218   : > { %v1285_v54 = vpop.f32.mrf.mxu0 }
 0x21d   : > { %v1244_v55 = vpop.f32.mrf.mxu3 }
 0x21e   : > { %v1286_v56 = vadd.f32 %v1285_v54, %v1244_v55 }
 0x220   : > { %v1288_v60 = vpop.f32.mrf.mxu0 }
 0x221   : > { %v1333_v58 = vpop.f32.mrf.mxu1 }
 0x222   : > { %v1345_v61 = vadd.f32 %v1333_v58, %v1286_v56 }
 0x224   : > { %v1353_v62 = vadd.f32 %v1854_v57, %v1345_v61 }
 0x225   : > { %v1247_v63 = vpop.f32.mrf.mxu3 }
 0x226   : > { %vm1357_vm2 = vcmp.ge.f32.partialorder %v1353_v62, 0.0  ;;  %v1361_v59 = vmul.f32 0.1, %v1353_v62  ;;  %v1289_v0 = vadd.f32 %v1288_v60, %v1247_v63 }
 0x228   : > { %v1365_v1 = vsel %vm1357_vm2, %v1353_v62, %v1361_v59  ;;  %v1291_v3 = vpop.f32.mrf.mxu0 }
 0x229   : > { %1369 = vst.msk [vmem:[%s2213_s24] sm:$0xff] %vm1190_vm12, %v1365_v1  ;;  %v1336_v48 = vpop.f32.mrf.mxu1 }
 0x22a   : > { %1376 = vst.msk [vmem:[#allocation4 + $0x3] sm:$0xff] %vm1190_vm12, %v1365_v1  ;;  %v1346_v2 = vadd.f32 %v1336_v48, %v1289_v0 }
 0x22c   : > { %v1354_v4 = vadd.f32 %v1854_v57, %v1346_v2 }
 0x22d   : > { %v1250_v7 = vpop.f32.mrf.mxu3 }
 0x22e   : > { %vm1358_vm3 = vcmp.ge.f32.partialorder %v1354_v4, 0.0  ;;  %v1362_v6 = vmul.f32 0.1, %v1354_v4  ;;  %v1292_v8 = vadd.f32 %v1291_v3, %v1250_v7 }
 0x230   : > { %v1366_v9 = vsel %vm1358_vm3, %v1354_v4, %v1362_v6  ;;  %v1294_v15 = vpop.f32.mrf.mxu0 }
 0x231   : > { %1370 = vst.msk [vmem:[%s2213_s24 + $0x8] sm:$0xff] %vm1190_vm12, %v1366_v9  ;;  %v1339_v51 = vpop.f32.mrf.mxu1  ;;  %v1387_v10 = vld [vmem:[#allocation4 + $0x1] sm:$0xff] }
 0x232   : > { %v1380_v11 = vld [vmem:[#allocation4] sm:$0xff]  ;;  %1377 = vst.msk [vmem:[#allocation4 + $0xb] sm:$0xff] %vm1190_vm12, %v1366_v9  ;;  %v1347_v13 = vadd.f32 %v1339_v51, %v1292_v8  ;;  %1817 = vmatmul.msk.f32.vlgmr.msra.gmra.mxu2 %vm1190_vm12, %v1387_v10 }
 0x233   : > { %v1489_v12 = vld [vmem:[#allocation4 + $0x2] sm:$0xff]  ;;  %1822 = vmatmul.msk.f32.vlgmr.msrb.gmra.mxu3 %vm1190_vm12, %v1380_v11 }
 0x234   : > { %1829 = vmatmul.msk.f32.vlgmr.msrb.gmra.mxu0 %vm1190_vm12, %v1489_v12  ;;  %v1355_v14 = vadd.f32 %v1854_v57, %v1347_v13 }
 0x235   : > { %v1253_v17 = vpop.f32.mrf.mxu3 }
 0x236   : > { %vm1359_vm4 = vcmp.ge.f32.partialorder %v1355_v14, 0.0  ;;  %v1363_v16 = vmul.f32 0.1, %v1355_v14  ;;  %v1295_v18 = vadd.f32 %v1294_v15, %v1253_v17 }
 0x238   : > { %v1367_v19 = vsel %vm1359_vm4, %v1355_v14, %v1363_v16 }
 0x239   : > { %1371 = vst.msk [vmem:[%s2213_s24 + $0x10] sm:$0xff] %vm1190_vm12, %v1367_v19  ;;  %v1342_v20 = vpop.f32.mrf.mxu1  ;;  %v1388_v21 = vld [vmem:[#allocation4 + $0x9] sm:$0xff] }
 0x23a   : > { %v1381_v22 = vld [vmem:[#allocation4 + $0x8] sm:$0xff]  ;;  %1378 = vst.msk [vmem:[#allocation4 + $0x13] sm:$0xff] %vm1190_vm12, %v1367_v19  ;;  %v1348_v49 = vadd.f32 %v1342_v20, %v1295_v18  ;;  %1818 = vmatmul.msk.f32.gmra.mxu2 %vm1190_vm12, %v1388_v21 }
 0x23b   : > { %v1490_v23 = vld [vmem:[#allocation4 + $0xa] sm:$0xff]  ;;  %1823 = vmatmul.msk.f32.gmra.mxu3 %vm1190_vm12, %v1381_v22 }
 0x23c   : > { %1830 = vmatmul.msk.f32.gmra.mxu0 %vm1190_vm12, %v1490_v23  ;;  %v1356_v24 = vadd.f32 %v1854_v57, %v1348_v49 }
 0x23e   : > { %vm1360_vm5 = vcmp.ge.f32.partialorder %v1356_v24, 0.0  ;;  %v1364_v25 = vmul.f32 0.1, %v1356_v24 }
 0x240   : > { %v1368_v26 = vsel %vm1360_vm5, %v1356_v24, %v1364_v25 }
 0x241   : > { %1372 = vst.msk [vmem:[%s2213_s24 + $0x18] sm:$0xff] %vm1190_vm12, %v1368_v26  ;;  %v1389_v27 = vld [vmem:[#allocation4 + $0x11] sm:$0xff] }
 0x242   : > { %v1382_v28 = vld [vmem:[#allocation4 + $0x10] sm:$0xff]  ;;  %1379 = vst.msk [vmem:[#allocation4 + $0x1b] sm:$0xff] %vm1190_vm12, %v1368_v26  ;;  %1819 = vmatmul.msk.f32.gmra.mxu2 %vm1190_vm12, %v1389_v27 }
 0x243   : > { %v1491_v29 = vld [vmem:[#allocation4 + $0x12] sm:$0xff]  ;;  %1824 = vmatmul.msk.f32.gmra.mxu3 %vm1190_vm12, %v1382_v28 }
 0x244   : > { %1831 = vmatmul.msk.f32.gmra.mxu0 %vm1190_vm12, %v1491_v29 }
 0x249   : > { %v1390_v30 = vld [vmem:[#allocation4 + $0x19] sm:$0xff]  ;;  %v1391_v33 = vld [vmem:[#allocation4 + $0x21] sm:$0xf] }
 0x24a   : > { %v1383_v31 = vld [vmem:[#allocation4 + $0x18] sm:$0xff]  ;;  %1820 = vmatmul.msk.f32.gmra.mxu2 %vm1190_vm12, %v1390_v30  ;;  %v1384_v34 = vld [vmem:[#allocation4 + $0x20] sm:$0xf] }
 0x24b   : > { %v1492_v32 = vld [vmem:[#allocation4 + $0x1a] sm:$0xff]  ;;  %1825 = vmatmul.msk.f32.gmra.mxu3 %vm1190_vm12, %v1383_v31  ;;  %v1493_v35 = vld [vmem:[#allocation4 + $0x22] sm:$0xf] }
 0x24c   : > { %1832 = vmatmul.msk.f32.gmra.mxu0 %vm1190_vm12, %v1492_v32 }
 0x252   : > { %1821 = vmatmul.msk.f32.gmra.mxu2 %vm1190_vm12, %v1391_v33 }
 0x253   : > { %1826 = vmatmul.msk.f32.gmra.mxu3 %vm1190_vm12, %v1384_v34 }
 0x254   : > { %1833 = vmatmul.msk.f32.gmra.mxu0 %vm1190_vm12, %v1493_v35 }
 0x2b1   : > { %v1529_v5 = vpop.f32.mrf.mxu0 }
 0x2b5   : > { %v1427_v36 = vpop.f32.mrf.mxu2 }
 0x2b6   : > { %v1474_v37 = vpop.f32.mrf.mxu3 }
 0x2b7   : > { %v1475_v38 = vadd.f32 %v1474_v37, %v1427_v36 }
 0x2b9   : > { %v1544_v40 = vadd.f32 %v1529_v5, %v1475_v38  ;;  %v1532_v41 = vpop.f32.mrf.mxu0 }
 0x2bb   : > { %v1553_v42 = vadd.f32 %v1855_v39, %v1544_v40 }
 0x2bd   : > { %1558 = vst.msk [vmem:[%s450_s29] sm:$0xff] %vm470_vm0, %v1553_v42  ;;  %v1430_v43 = vpop.f32.mrf.mxu2 }
 0x2be   : > { %v1477_v44 = vpop.f32.mrf.mxu3 }
 0x2bf   : > { %v1478_v45 = vadd.f32 %v1477_v44, %v1430_v43 }
 0x2c1   : > { %v1545_v46 = vadd.f32 %v1532_v41, %v1478_v45  ;;  %v1535_v50 = vpop.f32.mrf.mxu0 }
 0x2c3   : > { %v1554_v47 = vadd.f32 %v1855_v39, %v1545_v46 }
 0x2c5   : > { %1559 = vst.msk [vmem:[%s450_s29 + $0x8] sm:$0xff] %vm470_vm0, %v1554_v47  ;;  %v1433_v52 = vpop.f32.mrf.mxu2 }
 0x2c6   : > { %v1480_v53 = vpop.f32.mrf.mxu3 }
 0x2c7   : > { %v1481_v54 = vadd.f32 %v1480_v53, %v1433_v52 }
 0x2c9   : > { %v1546_v55 = vadd.f32 %v1535_v50, %v1481_v54  ;;  %v1538_v57 = vpop.f32.mrf.mxu0 }
 0x2cb   : > { %v1555_v56 = vadd.f32 %v1855_v39, %v1546_v55 }
 0x2cd   : > { %1560 = vst.msk [vmem:[%s450_s29 + $0x10] sm:$0xff] %vm470_vm0, %v1555_v56  ;;  %v1436_v58 = vpop.f32.mrf.mxu2 }
 0x2ce   : > { %v1483_v60 = vpop.f32.mrf.mxu3 }
 0x2cf   : > { %v1484_v61 = vadd.f32 %v1483_v60, %v1436_v58 }
 0x2d1   : > { %v1547_v62 = vadd.f32 %v1538_v57, %v1484_v61  ;;  %v1541_v48 = vpop.f32.mrf.mxu0 }
 0x2d3   : > { %v1556_v59 = vadd.f32 %v1855_v39, %v1547_v62 }
 0x2d5   : > { %1561 = vst.msk [vmem:[%s450_s29 + $0x18] sm:$0xff] %vm470_vm0, %v1556_v59  ;;  %v1439_v63 = vpop.f32.mrf.mxu2 }
 0x2d6   : > { %v1486_v0 = vpop.f32.mrf.mxu3 }
 0x2d7   : > { %v1487_v1 = vadd.f32 %v1486_v0, %v1439_v63 }
 0x2d9   : > { %v1548_v2 = vadd.f32 %v1541_v48, %v1487_v1 }
 0x2db   : > { %v1557_v3 = vadd.f32 %v1855_v39, %v1548_v2 }
 0x2dd   : > { %1563 = vst.msk [vmem:[%s450_s29 + $0x20] sm:$0xf] %vm1562_vm6, %v1557_v3 }
 0x2de PF: > { %s23_s21 = sadd.s32 1, %s1862_s21  }
 0x2df   : > { %p20_p4 = scmp.ge.s32.totalorder %s23_s21, 6  }
 0x2e1   :  { %22 = sbr.rel (!%p20_p4) target bundleno = 1 (0x1), region = 153 }

// kernel: msdiscriminator_forward.3
= control target key start
LH: loop header
LB: loop body
LE: loop exit
PB: predicated region body
PF: predicated region fallthrough
CT: control target
= control target key end

     0   :  { %s1668_s21 = smov 0   ;;  %s1978_s0 = inlined_call_operand.vmem [shape: f32[4,37,8], index: 0, kind: input, shape index: {}]   ;;  %s1979_s1 = inlined_call_operand.vmem [shape: f32[5,8,16], index: 1, kind: input, shape index: {}]   ;;  %s1980_s2 = inlined_call_operand.vmem [shape: f32[1,16], index: 2, kind: input, shape index: {}]   ;;  %s1981_s3 = inlined_call_operand.vmem [shape: f32[5,16,32], index: 3, kind: input, shape index: {}]   ;;  %s1982_s4 = inlined_call_operand.vmem [shape: f32[1,32], index: 4, kind: input, shape index: {}]   ;;  %s1983_s5 = inlined_call_operand.vmem [shape: f32[3,32,32], index: 5, kind: input, shape index: {}]   ;;  %s1984_s6 = inlined_call_operand.vmem [shape: f32[1,32], index: 6, kind: input, shape index: {}]   ;;  %s1985_s7 = inlined_call_operand.vmem [shape: f32[3,32,8], index: 7, kind: input, shape index: {}]   ;;  %s1986_s8 = inlined_call_operand.vmem [shape: f32[1,8], index: 8, kind: input, shape index: {}]   ;;  %s1987_s9 = inlined_call_operand.vmem [shape: f32[4,33,16], index: 9, kind: output, shape index: {0}]   ;;  %s1988_s10 = inlined_call_operand.vmem [shape: f32[4,17,32], index: 10, kind: output, shape index: {1}]   ;;  %s1989_s11 = inlined_call_operand.vmem [shape: f32[4,17,32], index: 11, kind: output, shape index: {2}]   ;;  %s1990_s12 = inlined_call_operand.vmem [shape: f32[4,21,8], index: 12, kind: output, shape index: {3}]  }
   0x1 LB: > { %s1480_s22 = sadd.s32 4294967295, %s1600_s21   ;;  %p1484_p0 = scmp.ge.s32.totalorder %s1600_s21, 1  ;;  %s1600_s21 = sphi %s1668_s21, %s23_s21  }
   0x2   : > { %p369_p1 = scmp.lt.s32.totalorder %s1600_s21, 5 }
   0x4   : > { %p370_p2 = pnand %p1484_p0, %p369_p1 }
   0x5   : > { %p426_p3 = scmp.lt.s32.totalorder (!%p370_p2), %s1480_s22, 3 }
   0x6   : > { %373 = sbr.rel (%p370_p2) target bundleno = 686 (0x2ae), region = 56 }
   0xb   : > { %v1490_v0 = vld [vmem:[%s1979_s1 + $0x8] sm:$0xff]  ;;  %v1513_v1 = vld [vmem:[%s1979_s1 + $0x20] sm:$0xff]  ;;  %v1501_v2 = vld [vmem:[%s1979_s1 + $0x10] sm:$0xff]  ;;  %s1992_s22 = smov (!%p426_p3, %s1480_s22), 3  ;;  %vm464_vm0 = vcmask 64512   ;;  %vm767_vm1 = vcmask 123904  }
   0xc   : > { %495 = vmatpush.msra.mxu0 %v1490_v0  ;;  %1578 = vmatpush.msra.mxu1 %v1490_v0  ;;  %v1507_v3 = vld [vmem:[%s1979_s1 + $0x18] sm:$0xff]  ;;  %v456_v4 = vld [vmem:[%s1979_s1] sm:$0xff]  ;;  %s1579_s15 = smul.u32 40, %s1992_s22  ;;  %v781_v30 = vld [vmem:[%s1981_s3 + $0x8] sm:$0xff]  ;;  %v1602_v40 = vmov 0.0   ;;  %vm760_vm3 = vcmask 130048  }
   0xd   : > { %596 = vmatpush.msra.mxu2 %v1501_v2  ;;  %655 = vmatpush.msra.mxu3 %v1507_v3  ;;  %v1520_v31 = vld [vmem:[%s1981_s3 + $0x18] sm:$0xff]  ;;  %v780_v38 = vld [vmem:[%s1981_s3] sm:$0xff]  ;;  %v1528_v39 = vld [vmem:[%s1981_s3 + $0x28] sm:$0xff]  ;;  %768 = vst.msk [vmem:[#allocation2] sm:$0x3] %vm767_vm1, %v1602_v40  ;;  %vm765_vm8 = vcmask 122880  }
   0xe   : > { %714 = vmatpush.msrb.mxu0 %v1513_v1  ;;  %542 = vmatpush.msrb.mxu1 %v456_v4  ;;  %s1699_s18 = scalar_lea.vmem %s1978_s0, %s1579_s15  ;;  %769 = vst.msk [vmem:[#allocation2 + $0x23] sm:$0x3] %vm767_vm1, %v1602_v40  ;;  %v1519_v44 = vld [vmem:[%s1981_s3 + $0x10] sm:$0xff]  ;;  %v1527_v45 = vld [vmem:[%s1981_s3 + $0x20] sm:$0xff]  ;;  %s1784_s20 = scalar_lea.vmem %s1987_s9, %s1579_s15  ;;  %v1538_v2 = vld [vmem:[%s1981_s3 + $0x48] sm:$0xff]  ;;  %vm1021_vm9 = vcmask 253952  }
   0xf   : > { %v457_v5 = vld [vmem:[%s1699_s18 + $0x1] sm:$0xff]  ;;  %v458_v9 = vld [vmem:[%s1699_s18 + $0x9] sm:$0xff]  ;;  %v459_v13 = vld [vmem:[%s1699_s18 + $0x11] sm:$0xff]  ;;  %849 = vmatpush.msrb.mxu2 %v781_v30  ;;  %893 = vmatpush.msrb.mxu3 %v1528_v39  ;;  %1023 = vst.msk [vmem:[#allocation3] sm:$0x1] %vm1021_vm9, %v1602_v40  ;;  %s1875_s15 = smul.u32 24, %s1992_s22 }
  0x10   : > { %v461_v6 = vld [vmem:[%s1699_s18 + $0x21] sm:$0x1]  ;;  %v559_v7 = vld [vmem:[%s1699_s18 + $0x2] sm:$0xff]  ;;  %1491 = vmatmul.msk.f32.vlgmr.msra.gmra.mxu0 %vm464_vm0, %v457_v5  ;;  %v560_v11 = vld [vmem:[%s1699_s18 + $0xa] sm:$0xff]  ;;  %1024 = vst.msk [vmem:[#allocation3 + $0x12] sm:$0x1] %vm1021_vm9, %v1602_v40 }
  0x11   : > { %1495 = vmatmul.msk.f32.vlgmr.msra.gmra.mxu1 %vm464_vm0, %v461_v6  ;;  %v618_v8 = vld [vmem:[%s1699_s18 + $0x3] sm:$0xff]  ;;  %1502 = vmatmul.msk.f32.vlgmr.msra.gmra.mxu2 %vm464_vm0, %v559_v7  ;;  %v619_v12 = vld [vmem:[%s1699_s18 + $0xb] sm:$0xff]  ;;  %v620_v16 = vld [vmem:[%s1699_s18 + $0x13] sm:$0xff]  ;;  %s1881_s27 = scalar_lea.vmem %s1988_s10, %s1875_s15  ;;  %vm1018_vm11 = vcmask 261120   ;;  %vm1178_vm14 = vcmask 256000   ;;  %s1946_s24 = scalar_lea.vmem %s1989_s11, %s1875_s15 }
  0x12   : > { %1508 = vmatmul.msk.f32.vlgmr.msra.gmra.mxu3 %vm464_vm0, %v618_v8  ;;  %v451_v10 = vld [vmem:[%s1699_s18] sm:$0xff]  ;;  %v452_v14 = vld [vmem:[%s1699_s18 + $0x8] sm:$0xff]  ;;  %v561_v15 = vld [vmem:[%s1699_s18 + $0x12] sm:$0xff]  ;;  %814 = vmatpush.msra.mxu1 %v1520_v31  ;;  %1179 = vst.msk [vmem:[#allocation4] sm:$0x7] %vm1178_vm14, %v1602_v40  ;;  %s450_s28 = scalar_lea.vmem %s1990_s12, %s1875_s15 }
  0x13   : > { %v460_v17 = vld [vmem:[%s1699_s18 + $0x19] sm:$0xff]  ;;  %v453_v18 = vld [vmem:[%s1699_s18 + $0x10] sm:$0xff]  ;;  %v677_v22 = vld [vmem:[%s1699_s18 + $0x4] sm:$0xff]  ;;  %850 = vmatpush.msrb.mxu2 %v780_v38  ;;  %894 = vmatpush.msrb.mxu3 %v1527_v45  ;;  %1180 = vst.msk [vmem:[#allocation4 + $0x14] sm:$0x7] %vm1178_vm14, %v1602_v40 }
  0x14   : > { %v562_v19 = vld [vmem:[%s1699_s18 + $0x1a] sm:$0xff]  ;;  %v563_v23 = vld [vmem:[%s1699_s18 + $0x22] sm:$0x1]  ;;  %v622_v24 = vld [vmem:[%s1699_s18 + $0x23] sm:$0x1]  ;;  %815 = vmatpush.msra.mxu1 %v1519_v44 }
  0x15   : > { %v621_v20 = vld [vmem:[%s1699_s18 + $0x1b] sm:$0xff]  ;;  %v678_v26 = vld [vmem:[%s1699_s18 + $0xc] sm:$0xff]  ;;  %v681_v29 = vld [vmem:[%s1699_s18 + $0x24] sm:$0x1]  ;;  %987 = vmatpush.msra.mxu2 %v1538_v2 }
  0x16   : > { %v454_v21 = vld [vmem:[%s1699_s18 + $0x18] sm:$0xff]  ;;  %v455_v25 = vld [vmem:[%s1699_s18 + $0x20] sm:$0x1] }
  0x17   : > { %v679_v27 = vld [vmem:[%s1699_s18 + $0x14] sm:$0xff]  ;;  %v680_v28 = vld [vmem:[%s1699_s18 + $0x1c] sm:$0xff] }
  0x18   : > { %1492 = vmatmul.msk.f32.gmra.mxu0 %vm464_vm0, %v458_v9  ;;  %v1776_v52 = vld [vmem:[%s1980_s2] ss:$0 sm:$0xff]  ;;  %v1533_v3 = vld [vmem:[%s1981_s3 + $0x38] sm:$0xff] }
  0x19   : > { %1496 = vmatmul.msk.f32.vlgmr.msrb.gmra.mxu1 %vm464_vm0, %v451_v10  ;;  %1503 = vmatmul.msk.f32.gmra.mxu2 %vm464_vm0, %v560_v11  ;;  %v1537_v5 = vld [vmem:[%s1981_s3 + $0x40] sm:$0xff] }
  0x1a   : > { %1509 = vmatmul.msk.f32.gmra.mxu3 %vm464_vm0, %v619_v12  ;;  %940 = vmatpush.msrb.mxu1 %v1533_v3  ;;  %v1542_v2 = vld [vmem:[%s1983_s5 + $0x20] sm:$0xff] }
  0x1b   : > { %988 = vmatpush.msra.mxu2 %v1537_v5  ;;  %v1031_v3 = vld [vmem:[%s1983_s5] sm:$0xff] }
  0x1c   : > { %v1569_v40 = vld [vmem:[%s1985_s7 + $0x40] sm:$0xff] }
  0x20   : > { %1493 = vmatmul.msk.f32.gmra.mxu0 %vm464_vm0, %v459_v13 }
  0x21   : > { %1497 = vmatmul.msk.f32.gmra.mxu1 %vm464_vm0, %v452_v14  ;;  %1504 = vmatmul.msk.f32.gmra.mxu2 %vm464_vm0, %v561_v15 }
  0x22   : > { %1510 = vmatmul.msk.f32.gmra.mxu3 %vm464_vm0, %v620_v16  ;;  %v1532_v16 = vld [vmem:[%s1981_s3 + $0x30] sm:$0xff] }
  0x23   : > { %941 = vmatpush.msrb.mxu1 %v1532_v16 }
  0x28   : > { %1494 = vmatmul.msk.f32.gmra.mxu0 %vm464_vm0, %v460_v17 }
  0x29   : > { %1498 = vmatmul.msk.f32.gmra.mxu1 %vm464_vm0, %v453_v18  ;;  %1505 = vmatmul.msk.f32.gmra.mxu2 %vm464_vm0, %v562_v19 }
  0x2a   : > { %1511 = vmatmul.msk.f32.gmra.mxu3 %vm464_vm0, %v621_v20 }
  0x30   : > { %1514 = vmatmul.msk.f32.vlgmr.msrb.gmra.mxu0 %vm464_vm0, %v677_v22 }
  0x31   : > { %1499 = vmatmul.msk.f32.gmra.mxu1 %vm464_vm0, %v454_v21  ;;  %1506 = vmatmul.msk.f32.gmra.mxu2 %vm464_vm0, %v563_v23 }
  0x32   : > { %1512 = vmatmul.msk.f32.gmra.mxu3 %vm464_vm0, %v622_v24 }
  0x38   : > { %1515 = vmatmul.msk.f32.gmra.mxu0 %vm464_vm0, %v678_v26 }
  0x39   : > { %1500 = vmatmul.msk.f32.gmra.mxu1 %vm464_vm0, %v455_v25 }
  0x40   : > { %1516 = vmatmul.msk.f32.gmra.mxu0 %vm464_vm0, %v679_v27 }
  0x48   : > { %1517 = vmatmul.msk.f32.gmra.mxu0 %vm464_vm0, %v680_v28 }
  0x50   : > { %1518 = vmatmul.msk.f32.gmra.mxu0 %vm464_vm0, %v681_v29 }
  0x8d   : > { %v497_v32 = vpop.f32.mrf.mxu0 }
  0x8e   : > { %v1757_v33 = vpop.f32.mrf.mxu1 }
  0x94   : > { %v598_v36 = vpop.f32.mrf.mxu2 }
  0x95   : > { %v500_v34 = vpop.f32.mrf.mxu0  ;;  %v657_v41 = vpop.f32.mrf.mxu3 }
  0x96   : > { %v544_v35 = vpop.f32.mrf.mxu1 }
  0x97   : > { %v545_v43 = vadd.f32 %v544_v35, %v497_v32 }
  0x99   : > { %v613_v48 = vadd.f32 %v598_v36, %v545_v43 }
  0x9b   : > { %v672_v50 = vadd.f32 %v657_v41, %v613_v48 }
  0x9c   : > { %v601_v47 = vpop.f32.mrf.mxu2 }
  0x9d   : > { %v503_v37 = vpop.f32.mrf.mxu0  ;;  %v660_v49 = vpop.f32.mrf.mxu3 }
  0x9e   : > { %v547_v42 = vpop.f32.mrf.mxu1 }
  0x9f   : > { %v548_v51 = vadd.f32 %v547_v42, %v500_v34 }
  0xa1   : > { %v614_v56 = vadd.f32 %v601_v47, %v548_v51 }
  0xa3   : > { %v673_v60 = vadd.f32 %v660_v49, %v614_v56  ;;  %v1033_v56 = vld [vmem:[%s1983_s5 + $0x10] sm:$0xff] }
  0xa4   : > { %v604_v58 = vpop.f32.mrf.mxu2 }
  0xa5   : > { %v506_v46 = vpop.f32.mrf.mxu0  ;;  %v663_v63 = vpop.f32.mrf.mxu3 }
  0xa6   : > { %v550_v53 = vpop.f32.mrf.mxu1 }
  0xa7   : > { %v551_v61 = vadd.f32 %v550_v53, %v503_v37  ;;  %v960_v53 = vld [vmem:[#allocation2 + $0x24] ss:$2 sm:$0x1] }
  0xa9   : > { %v615_v6 = vadd.f32 %v604_v58, %v551_v61  ;;  %v1032_v61 = vld [vmem:[%s1983_s5 + $0x8] sm:$0xff] }
  0xab   : > { %v674_v10 = vadd.f32 %v663_v63, %v615_v6 }
  0xac   : > { %v607_v9 = vpop.f32.mrf.mxu2 }
  0xad   : > { %v716_v54 = vpop.f32.mrf.mxu0  ;;  %v666_v15 = vpop.f32.mrf.mxu3 }
  0xae   : > { %v731_v55 = vadd.f32 %v716_v54, %v672_v50  ;;  %v553_v4 = vpop.f32.mrf.mxu1  ;;  %v1034_v54 = vld [vmem:[%s1983_s5 + $0x18] sm:$0xff] }
  0xaf   : > { %v554_v11 = vadd.f32 %v553_v4, %v506_v46  ;;  %1099 = vmatpush.msra.mxu0 %v1034_v54  ;;  %v1553_v4 = vld [vmem:[%s1983_s5 + $0x48] sm:$0xff] }
  0xb0   : > { %v740_v57 = vadd.f32 %v1776_v52, %v731_v55  ;;  %v1545_v55 = vld [vmem:[%s1983_s5 + $0x38] sm:$0xff]  ;;  %v1560_v54 = vld [vmem:[%s1985_s7 + $0x28] sm:$0xff] }
  0xb1   : > { %v616_v17 = vadd.f32 %v607_v9, %v554_v11  ;;  %1064 = vmatpush.msra.mxu3 %v1545_v55  ;;  %1100 = vmatpush.msra.mxu0 %v1033_v56  ;;  %v1188_v55 = vld [vmem:[%s1985_s7 + $0x8] sm:$0xff]  ;;  %v1571_v56 = vld [vmem:[%s1985_s7 + $0x50] sm:$0xff] }
  0xb2   : > { %vm745_vm2 = vcmp.ge.f32.partialorder %v740_v57, 0.0  ;;  %v750_v59 = vmul.f32 0.1, %v740_v57 }
  0xb3   : > { %v675_v21 = vadd.f32 %v666_v15, %v616_v17  ;;  %1101 = vmatpush.msra.mxu0 %v1032_v61 }
  0xb4   : > { %v755_v62 = vsel %vm745_vm2, %v740_v57, %v750_v59  ;;  %v610_v24 = vpop.f32.mrf.mxu2  ;;  %v1544_v57 = vld [vmem:[%s1983_s5 + $0x30] sm:$0xff] }
  0xb5   : > { %761 = vst.msk [vmem:[%s1784_s20] sm:$0xff] %vm760_vm3, %v755_v62  ;;  %v719_v0 = vpop.f32.mrf.mxu0  ;;  %v669_v32 = vpop.f32.mrf.mxu3  ;;  %1065 = vmatpush.msra.mxu3 %v1544_v57  ;;  %1102 = vmatpush.msra.mxu0 %v1031_v3  ;;  %v1570_v57 = vld [vmem:[%s1985_s7 + $0x48] sm:$0xff] }
  0xb6   : > { %770 = vst.msk [vmem:[#allocation2 + $0x2] sm:$0xff] %vm760_vm3, %v755_v62  ;;  %v732_v1 = vadd.f32 %v719_v0, %v673_v60  ;;  %v556_v19 = vpop.f32.mrf.mxu1  ;;  %v1555_v60 = vld [vmem:[%s1983_s5 + $0x58] sm:$0xff]  ;;  %v1543_v62 = vld [vmem:[%s1983_s5 + $0x28] sm:$0xff]  ;;  %v1554_v0 = vld [vmem:[%s1983_s5 + $0x50] sm:$0xff] }
  0xb7   : > { %v557_v22 = vadd.f32 %v556_v19, %v1757_v33  ;;  %1066 = vmatpush.msra.mxu3 %v1543_v62 }
  0xb8   : > { %v741_v7 = vadd.f32 %v1776_v52, %v732_v1 }
  0xb9   : > { %v617_v30 = vadd.f32 %v610_v24, %v557_v22  ;;  %1067 = vmatpush.msra.mxu3 %v1542_v2 }
  0xba   : > { %vm746_vm4 = vcmp.ge.f32.partialorder %v741_v7, 0.0  ;;  %v751_v8 = vmul.f32 0.1, %v741_v7 }
  0xbb   : > { %v676_v34 = vadd.f32 %v669_v32, %v617_v30 }
  0xbc   : > { %v756_v12 = vsel %vm746_vm4, %v741_v7, %v751_v8  ;;  %v1552_v7 = vld [vmem:[%s1983_s5 + $0x40] sm:$0xff] }
  0xbd   : > { %762 = vst.msk [vmem:[%s1784_s20 + $0x8] sm:$0xff] %vm760_vm3, %v756_v12  ;;  %v722_v13 = vpop.f32.mrf.mxu0 }
  0xbe   : > { %771 = vst.msk [vmem:[#allocation2 + $0xa] sm:$0xff] %vm760_vm3, %v756_v12  ;;  %v733_v14 = vadd.f32 %v722_v13, %v674_v10  ;;  %v1591_v13 = vld [vmem:[%s1982_s4] ss:$0 sm:$0xff] }
  0xc0   : > { %v742_v18 = vadd.f32 %v1776_v52, %v733_v14 }
  0xc2   : > { %vm747_vm5 = vcmp.ge.f32.partialorder %v742_v18, 0.0  ;;  %v752_v20 = vmul.f32 0.1, %v742_v18 }
  0xc4   : > { %v757_v23 = vsel %vm747_vm5, %v742_v18, %v752_v20 }
  0xc5   : > { %763 = vst.msk [vmem:[%s1784_s20 + $0x10] sm:$0xff] %vm760_vm3, %v757_v23  ;;  %v725_v25 = vpop.f32.mrf.mxu0  ;;  %v783_v26 = vld [vmem:[#allocation2 + $0x1] ss:$2 sm:$0xff]  ;;  %v775_v27 = vld [vmem:[#allocation2] ss:$2 sm:$0xff] }
  0xc6   : > { %772 = vst.msk [vmem:[#allocation2 + $0x12] sm:$0xff] %vm760_vm3, %v757_v23  ;;  %v734_v28 = vadd.f32 %v725_v25, %v675_v21  ;;  %1521 = vmatmul.msk.f32.vlgmr.msra.gmra.mxu1 %vm760_vm3, %v783_v26  ;;  %1524 = vmatmul.msk.f32.vlgmr.msrb.gmra.mxu2 %vm760_vm3, %v775_v27  ;;  %v862_v29 = vld [vmem:[#allocation2 + $0x2] ss:$2 sm:$0xff]  ;;  %v909_v48 = vld [vmem:[#allocation2 + $0x3] ss:$2 sm:$0xff] }
  0xc7   : > { %1529 = vmatmul.msk.f32.vlgmr.msrb.gmra.mxu3 %vm760_vm3, %v862_v29  ;;  %1142 = vmatpush.msra.mxu1 %v1555_v60 }
  0xc8   : > { %v743_v31 = vadd.f32 %v1776_v52, %v734_v28 }
  0xc9   : > { %1143 = vmatpush.msra.mxu1 %v1554_v0 }
  0xca   : > { %vm748_vm6 = vcmp.ge.f32.partialorder %v743_v31, 0.0  ;;  %v753_v33 = vmul.f32 0.1, %v743_v31 }
  0xcb   : > { %1144 = vmatpush.msra.mxu1 %v1553_v4 }
  0xcc   : > { %v758_v35 = vsel %vm748_vm6, %v743_v31, %v753_v33 }
  0xcd   : > { %764 = vst.msk [vmem:[%s1784_s20 + $0x18] sm:$0xff] %vm760_vm3, %v758_v35  ;;  %v728_v36 = vpop.f32.mrf.mxu0  ;;  %v956_v49 = vld [vmem:[#allocation2 + $0x4] ss:$2 sm:$0xff]  ;;  %1145 = vmatpush.msra.mxu1 %v1552_v7 }
  0xce   : > { %773 = vst.msk [vmem:[#allocation2 + $0x1a] sm:$0xff] %vm760_vm3, %v758_v35  ;;  %v735_v37 = vadd.f32 %v728_v36, %v676_v34 }
  0xd0   : > { %v744_v38 = vadd.f32 %v1776_v52, %v735_v37  ;;  %v913_v52 = vld [vmem:[#allocation2 + $0x23] ss:$2 sm:$0x1] }
  0xd2   : > { %vm749_vm7 = vcmp.ge.f32.partialorder %v744_v38, 0.0  ;;  %v754_v39 = vmul.f32 0.1, %v744_v38 }
  0xd4   : > { %v759_v41 = vsel %vm749_vm7, %v744_v38, %v754_v39 }
  0xd5   : > { %766 = vst.msk [vmem:[%s1784_s20 + $0x20] sm:$0x1] %vm765_vm8, %v759_v41  ;;  %v785_v42 = vld [vmem:[#allocation2 + $0x11] ss:$2 sm:$0xff]  ;;  %v777_v43 = vld [vmem:[#allocation2 + $0x10] ss:$2 sm:$0xff] }
  0xd6   : > { %774 = vst.msk [vmem:[#allocation2 + $0x22] sm:$0x1] %vm765_vm8, %v759_v41  ;;  %1522 = vmatmul.msk.f32.gmra.mxu1 %vm760_vm3, %v785_v42  ;;  %1525 = vmatmul.msk.f32.gmra.mxu2 %vm760_vm3, %v777_v43  ;;  %v864_v44 = vld [vmem:[#allocation2 + $0x12] ss:$2 sm:$0xff]  ;;  %v911_v50 = vld [vmem:[#allocation2 + $0x13] ss:$2 sm:$0xff] }
  0xd7   : > { %1530 = vmatmul.msk.f32.gmra.mxu3 %vm760_vm3, %v864_v44  ;;  %v787_v45 = vld [vmem:[#allocation2 + $0x21] ss:$2 sm:$0x1]  ;;  %v779_v46 = vld [vmem:[#allocation2 + $0x20] ss:$2 sm:$0x1] }
  0xdd   : > { %v866_v47 = vld [vmem:[#allocation2 + $0x22] ss:$2 sm:$0x1] }
  0xde   : > { %1523 = vmatmul.msk.f32.gmra.mxu1 %vm760_vm3, %v787_v45  ;;  %1526 = vmatmul.msk.f32.gmra.mxu2 %vm760_vm3, %v779_v46  ;;  %v958_v51 = vld [vmem:[#allocation2 + $0x14] ss:$2 sm:$0xff] }
  0xdf   : > { %1531 = vmatmul.msk.f32.gmra.mxu3 %vm760_vm3, %v866_v47 }
  0xe6   : > { %1534 = vmatmul.msk.f32.vlgmr.msrb.gmra.mxu1 %vm760_vm3, %v909_v48  ;;  %1539 = vmatmul.msk.f32.vlgmr.msra.gmra.mxu2 %vm760_vm3, %v956_v49  ;;  %v1115_v48 = vld [vmem:[#allocation3 + $0x12] sm:$0x1] }
  0xe7   : > { %v1562_v49 = vld [vmem:[%s1985_s7 + $0x38] sm:$0xff] }
  0xe8   : > { %1220 = vmatpush.msrb.mxu2 %v1562_v49 }
  0xee   : > { %1535 = vmatmul.msk.f32.gmra.mxu1 %vm760_vm3, %v911_v50  ;;  %1540 = vmatmul.msk.f32.gmra.mxu2 %vm760_vm3, %v958_v51  ;;  %v1190_v50 = vld [vmem:[%s1985_s7 + $0x18] sm:$0xff]  ;;  %v1561_v51 = vld [vmem:[%s1985_s7 + $0x30] sm:$0xff] }
  0xef   : > { %1255 = vmatpush.msrb.mxu3 %v1190_v50  ;;  %1221 = vmatpush.msrb.mxu2 %v1561_v51 }
  0xf1   : > { %1222 = vmatpush.msrb.mxu2 %v1560_v54 }
  0xf6   : > { %1536 = vmatmul.msk.f32.gmra.mxu1 %vm760_vm3, %v913_v52  ;;  %1541 = vmatmul.msk.f32.gmra.mxu2 %vm760_vm3, %v960_v53  ;;  %v1189_v52 = vld [vmem:[%s1985_s7 + $0x10] sm:$0xff]  ;;  %v1572_v53 = vld [vmem:[%s1985_s7 + $0x58] sm:$0xff]  ;;  %vm1324_vm3 = vcmask 61440  }
  0xf7   : > { %1256 = vmatpush.msrb.mxu3 %v1189_v52  ;;  %1298 = vmatpush.msrb.mxu0 %v1572_v53 }
  0xf9   : > { %1257 = vmatpush.msrb.mxu3 %v1188_v55  ;;  %1299 = vmatpush.msrb.mxu0 %v1571_v56 }
  0xfb   : > { %1300 = vmatpush.msrb.mxu0 %v1570_v57 }
  0xfd   : > { %1301 = vmatpush.msrb.mxu0 %v1569_v40 }
 0x143   : > { %v817_v58 = vpop.f32.mrf.mxu1 }
 0x149   : > { %v852_v59 = vpop.f32.mrf.mxu2 }
 0x14a   : > { %v853_v8 = vadd.f32 %v852_v59, %v817_v58  ;;  %v896_v9 = vpop.f32.mrf.mxu3  ;;  %v1559_v58 = vld [vmem:[%s1985_s7 + $0x20] sm:$0xff] }
 0x14b   : > { %v1187_v59 = vld [vmem:[%s1985_s7] sm:$0xff]  ;;  %1223 = vmatpush.msrb.mxu2 %v1559_v58 }
 0x14c   : > { %v905_v11 = vadd.f32 %v896_v9, %v853_v8  ;;  %1258 = vmatpush.msrb.mxu3 %v1187_v59 }
 0x153   : > { %v820_v63 = vpop.f32.mrf.mxu1 }
 0x159   : > { %v855_v1 = vpop.f32.mrf.mxu2 }
 0x15a   : > { %v856_v15 = vadd.f32 %v855_v1, %v820_v63  ;;  %v899_v17 = vpop.f32.mrf.mxu3  ;;  %v1592_v63 = vld [vmem:[%s1984_s6] ss:$0 sm:$0xff] }
 0x15b   : > { %v823_v5 = vpop.f32.mrf.mxu1 }
 0x15c   : > { %v906_v20 = vadd.f32 %v899_v17, %v856_v15 }
 0x161   : > { %v858_v6 = vpop.f32.mrf.mxu2 }
 0x162   : > { %v859_v25 = vadd.f32 %v858_v6, %v823_v5  ;;  %v902_v28 = vpop.f32.mrf.mxu3 }
 0x163   : > { %v943_v10 = vpop.f32.mrf.mxu1 }
 0x164   : > { %v952_v12 = vadd.f32 %v943_v10, %v905_v11  ;;  %v907_v30 = vadd.f32 %v902_v28, %v859_v25 }
 0x169   : > { %v990_v14 = vpop.f32.mrf.mxu2 }
 0x16a   : > { %v999_v16 = vadd.f32 %v990_v14, %v952_v12 }
 0x16b   : > { %v946_v18 = vpop.f32.mrf.mxu1 }
 0x16c   : > { %v1006_v19 = vadd.f32 %v1591_v13, %v999_v16  ;;  %v953_v23 = vadd.f32 %v946_v18, %v906_v20 }
 0x16e   : > { %vm1009_vm10 = vcmp.ge.f32.partialorder %v1006_v19, 0.0  ;;  %v1012_v21 = vmul.f32 0.1, %v1006_v19 }
 0x170   : > { %v1015_v22 = vsel %vm1009_vm10, %v1006_v19, %v1012_v21 }
 0x171   : > { %1019 = vst.msk [vmem:[%s1881_s27] sm:$0xff] %vm1018_vm11, %v1015_v22  ;;  %v993_v24 = vpop.f32.mrf.mxu2 }
 0x172   : > { %1025 = vst.msk [vmem:[#allocation3 + $0x1] sm:$0xff] %vm1018_vm11, %v1015_v22  ;;  %v1000_v26 = vadd.f32 %v993_v24, %v953_v23 }
 0x173   : > { %v949_v29 = vpop.f32.mrf.mxu1 }
 0x174   : > { %v1007_v27 = vadd.f32 %v1591_v13, %v1000_v26  ;;  %v954_v33 = vadd.f32 %v949_v29, %v907_v30 }
 0x176   : > { %vm1010_vm12 = vcmp.ge.f32.partialorder %v1007_v27, 0.0  ;;  %v1013_v31 = vmul.f32 0.1, %v1007_v27 }
 0x178   : > { %v1016_v32 = vsel %vm1010_vm12, %v1007_v27, %v1013_v31 }
 0x179   : > { %1020 = vst.msk [vmem:[%s1881_s27 + $0x8] sm:$0xff] %vm1018_vm11, %v1016_v32  ;;  %v996_v34 = vpop.f32.mrf.mxu2  ;;  %v1035_v35 = vld [vmem:[#allocation3 + $0x1] sm:$0xff] }
 0x17a   : > { %v1028_v36 = vld [vmem:[#allocation3] sm:$0xff]  ;;  %1026 = vst.msk [vmem:[#allocation3 + $0x9] sm:$0xff] %vm1018_vm11, %v1016_v32  ;;  %v1001_v37 = vadd.f32 %v996_v34, %v954_v33  ;;  %1546 = vmatmul.msk.f32.vlgmr.msra.gmra.mxu3 %vm1018_vm11, %v1035_v35  ;;  %v1593_v34 = vld [vmem:[%s1986_s8] ss:$0 sm:$0xff] }
 0x17b   : > { %1549 = vmatmul.msk.f32.vlgmr.msra.gmra.mxu0 %vm1018_vm11, %v1028_v36 }
 0x17c   : > { %v1008_v38 = vadd.f32 %v1591_v13, %v1001_v37 }
 0x17e   : > { %vm1011_vm13 = vcmp.ge.f32.partialorder %v1008_v38, 0.0  ;;  %v1014_v39 = vmul.f32 0.1, %v1008_v38 }
 0x180   : > { %v1017_v41 = vsel %vm1011_vm13, %v1008_v38, %v1014_v39 }
 0x181   : > { %1022 = vst.msk [vmem:[%s1881_s27 + $0x10] sm:$0x1] %vm1021_vm9, %v1017_v41  ;;  %v1036_v42 = vld [vmem:[#allocation3 + $0x9] sm:$0xff] }
 0x182   : > { %v1029_v43 = vld [vmem:[#allocation3 + $0x8] sm:$0xff]  ;;  %1027 = vst.msk [vmem:[#allocation3 + $0x11] sm:$0x1] %vm1021_vm9, %v1017_v41  ;;  %1547 = vmatmul.msk.f32.gmra.mxu3 %vm1018_vm11, %v1036_v42  ;;  %v1030_v46 = vld [vmem:[#allocation3 + $0x10] sm:$0x1] }
 0x183   : > { %v1113_v44 = vld [vmem:[#allocation3 + $0x2] sm:$0xff]  ;;  %1550 = vmatmul.msk.f32.gmra.mxu0 %vm1018_vm11, %v1029_v43 }
 0x184   : > { %1556 = vmatmul.msk.f32.vlgmr.msra.gmra.mxu1 %vm1018_vm11, %v1113_v44 }
 0x189   : > { %v1037_v45 = vld [vmem:[#allocation3 + $0x11] sm:$0x1] }
 0x18a   : > { %v1114_v47 = vld [vmem:[#allocation3 + $0xa] sm:$0xff]  ;;  %1548 = vmatmul.msk.f32.gmra.mxu3 %vm1018_vm11, %v1037_v45 }
 0x18b   : > { %1551 = vmatmul.msk.f32.gmra.mxu0 %vm1018_vm11, %v1030_v46 }
 0x18c   : > { %1557 = vmatmul.msk.f32.gmra.mxu1 %vm1018_vm11, %v1114_v47 }
 0x194   : > { %1558 = vmatmul.msk.f32.gmra.mxu1 %vm1018_vm11, %v1115_v48 }
 0x1f8   : > { %v1104_v60 = vpop.f32.mrf.mxu0 }
 0x1fd   : > { %v1069_v61 = vpop.f32.mrf.mxu3 }
 0x1fe   : > { %v1105_v62 = vadd.f32 %v1104_v60, %v1069_v61 }
 0x200   : > { %v1107_v2 = vpop.f32.mrf.mxu0 }
 0x201   : > { %v1147_v0 = vpop.f32.mrf.mxu1 }
 0x202   : > { %v1156_v1 = vadd.f32 %v1147_v0, %v1105_v62 }
 0x204   : > { %v1163_v3 = vadd.f32 %v1592_v63, %v1156_v1 }
 0x205   : > { %v1072_v5 = vpop.f32.mrf.mxu3 }
 0x206   : > { %vm1166_vm15 = vcmp.ge.f32.partialorder %v1163_v3, 0.0  ;;  %v1169_v4 = vmul.f32 0.1, %v1163_v3  ;;  %v1108_v6 = vadd.f32 %v1107_v2, %v1072_v5 }
 0x208   : > { %v1172_v7 = vsel %vm1166_vm15, %v1163_v3, %v1169_v4  ;;  %v1110_v11 = vpop.f32.mrf.mxu0 }
 0x209   : > { %1175 = vst.msk [vmem:[%s1946_s24] sm:$0xff] %vm1018_vm11, %v1172_v7  ;;  %v1150_v8 = vpop.f32.mrf.mxu1 }
 0x20a   : > { %1181 = vst.msk [vmem:[#allocation4 + $0x3] sm:$0xff] %vm1018_vm11, %v1172_v7  ;;  %v1157_v9 = vadd.f32 %v1150_v8, %v1108_v6 }
 0x20c   : > { %v1164_v10 = vadd.f32 %v1592_v63, %v1157_v9 }
 0x20d   : > { %v1075_v13 = vpop.f32.mrf.mxu3 }
 0x20e   : > { %vm1167_vm1 = vcmp.ge.f32.partialorder %v1164_v10, 0.0  ;;  %v1170_v12 = vmul.f32 0.1, %v1164_v10  ;;  %v1111_v14 = vadd.f32 %v1110_v11, %v1075_v13 }
 0x210   : > { %v1173_v15 = vsel %vm1167_vm1, %v1164_v10, %v1170_v12 }
 0x211   : > { %1176 = vst.msk [vmem:[%s1946_s24 + $0x8] sm:$0xff] %vm1018_vm11, %v1173_v15  ;;  %v1153_v16 = vpop.f32.mrf.mxu1  ;;  %v1191_v17 = vld [vmem:[#allocation4 + $0x1] sm:$0xff] }
 0x212   : > { %v1184_v18 = vld [vmem:[#allocation4] sm:$0xff]  ;;  %1182 = vst.msk [vmem:[#allocation4 + $0xb] sm:$0xff] %vm1018_vm11, %v1173_v15  ;;  %v1158_v20 = vadd.f32 %v1153_v16, %v1111_v14  ;;  %1563 = vmatmul.msk.f32.vlgmr.msrb.gmra.mxu2 %vm1018_vm11, %v1191_v17 }
 0x213   : > { %v1269_v19 = vld [vmem:[#allocation4 + $0x2] sm:$0xff]  ;;  %1566 = vmatmul.msk.f32.vlgmr.msrb.gmra.mxu3 %vm1018_vm11, %v1184_v18 }
 0x214   : > { %1573 = vmatmul.msk.f32.vlgmr.msrb.gmra.mxu0 %vm1018_vm11, %v1269_v19  ;;  %v1165_v21 = vadd.f32 %v1592_v63, %v1158_v20 }
 0x216   : > { %vm1168_vm2 = vcmp.ge.f32.partialorder %v1165_v21, 0.0  ;;  %v1171_v22 = vmul.f32 0.1, %v1165_v21 }
 0x218   : > { %v1174_v23 = vsel %vm1168_vm2, %v1165_v21, %v1171_v22 }
 0x219   : > { %1177 = vst.msk [vmem:[%s1946_s24 + $0x10] sm:$0x1] %vm1021_vm9, %v1174_v23  ;;  %v1192_v24 = vld [vmem:[#allocation4 + $0x9] sm:$0xff] }
 0x21a   : > { %v1185_v25 = vld [vmem:[#allocation4 + $0x8] sm:$0xff]  ;;  %1183 = vst.msk [vmem:[#allocation4 + $0x13] sm:$0x1] %vm1021_vm9, %v1174_v23  ;;  %1564 = vmatmul.msk.f32.gmra.mxu2 %vm1018_vm11, %v1192_v24 }
 0x21b   : > { %v1270_v26 = vld [vmem:[#allocation4 + $0xa] sm:$0xff]  ;;  %1567 = vmatmul.msk.f32.gmra.mxu3 %vm1018_vm11, %v1185_v25 }
 0x21c   : > { %1574 = vmatmul.msk.f32.gmra.mxu0 %vm1018_vm11, %v1270_v26 }
 0x221   : > { %v1193_v27 = vld [vmem:[#allocation4 + $0x11] sm:$0x1f] }
 0x222   : > { %v1186_v28 = vld [vmem:[#allocation4 + $0x10] sm:$0x1f]  ;;  %1565 = vmatmul.msk.f32.gmra.mxu2 %vm1018_vm11, %v1193_v27 }
 0x223   : > { %v1271_v29 = vld [vmem:[#allocation4 + $0x12] sm:$0x1f]  ;;  %1568 = vmatmul.msk.f32.gmra.mxu3 %vm1018_vm11, %v1186_v28 }
 0x224   : > { %1575 = vmatmul.msk.f32.gmra.mxu0 %vm1018_vm11, %v1271_v29 }
 0x291   : > { %v1303_v30 = vpop.f32.mrf.mxu0 }
 0x295   : > { %v1225_v31 = vpop.f32.mrf.mxu2 }
 0x296   : > { %v1260_v32 = vpop.f32.mrf.mxu3 }
 0x297   : > { %v1261_v33 = vadd.f32 %v1260_v32, %v1225_v31 }
 0x299   : > { %v1312_v35 = vadd.f32 %v1303_v30, %v1261_v33  ;;  %v1306_v37 = vpop.f32.mrf.mxu0 }
 0x29b   : > { %v1319_v36 = vadd.f32 %v1593_v34, %v1312_v35 }
 0x29d   : > { %1322 = vst.msk [vmem:[%s450_s28] sm:$0xff] %vm464_vm0, %v1319_v36  ;;  %v1228_v38 = vpop.f32.mrf.mxu2 }
 0x29e   : > { %v1263_v39 = vpop.f32.mrf.mxu3 }
 0x29f   : > { %v1264_v41 = vadd.f32 %v1263_v39, %v1228_v38 }
 0x2a1   : > { %v1313_v42 = vadd.f32 %v1306_v37, %v1264_v41  ;;  %v1309_v47 = vpop.f32.mrf.mxu0 }
 0x2a3   : > { %v1320_v43 = vadd.f32 %v1593_v34, %v1313_v42 }
 0x2a5   : > { %1323 = vst.msk [vmem:[%s450_s28 + $0x8] sm:$0xff] %vm464_vm0, %v1320_v43  ;;  %v1231_v44 = vpop.f32.mrf.mxu2 }
 0x2a6   : > { %v1266_v45 = vpop.f32.mrf.mxu3 }
 0x2a7   : > { %v1267_v46 = vadd.f32 %v1266_v45, %v1231_v44 }
 0x2a9   : > { %v1314_v48 = vadd.f32 %v1309_v47, %v1267_v46 }
 0x2ab   : > { %v1321_v49 = vadd.f32 %v1593_v34, %v1314_v48 }
 0x2ad   : > { %1325 = vst.msk [vmem:[%s450_s28 + $0x10] sm:$0x1f] %vm1324_vm3, %v1321_v49 }
 0x2ae PF: > { %s23_s21 = sadd.s32 1, %s1600_s21  }
 0x2af   : > { %p20_p4 = scmp.ge.s32.totalorder %s23_s21, 6  }
 0x2b1   :  { %22 = sbr.rel (!%p20_p4) target bundleno = 1 (0x1), region = 148 }

</bundles_post_ra>
